<compile_context>
chip_gen: v5e
topology: v5e:2x2
jax: 0.10.0
libtpu: 0.0.40
codegen_flags: <defaults>
</compile_context>

<pallas_src>
import functools
import math

import jax
import jax.numpy as jnp
from jax import lax
from jax.experimental import pallas as pl
from jax.experimental.pallas import tpu as pltpu


def _hardswish(x):
    # F.hardswish: x * relu6(x + 3) / 6
    return x * jnp.clip(x + 3.0, 0.0, 6.0) * (1.0 / 6.0)


# ----------------------------------------------------------------------------
# Pallas kernel: full CMPNN_GRU forward in a single invocation
# ----------------------------------------------------------------------------
def cmpnn_gru_kernel(
    node_ref,        # [N, d]    f32  node features
    src_ref,         # [L*Bp,1]  i32  graph_to_seq: node index feeding packed row t*Bp+b (-1 = pad)
    pos_ref,         # [N, 1]    i32  seq_to_graph: packed row index of each node
    batch_ref,       # [N, 1]    i32  graph id of each node (scatter-max)
    bias_ref,        # [1, d]    f32
    Wi_ref,          # [d, 6d]   bf16 fused [W_ih_fwd | W_ih_bwd]   (stored [in, out])
    bi_ref,          # [1, 6d]   f32  fused [b_ih_fwd | b_ih_bwd]
    Whf_ref, bhf_ref,  # [d,3d] f32 / [1,3d] f32   forward  W_hh / b_hh
    Whb_ref, bhb_ref,  # [d,3d] f32 / [1,3d] f32   backward W_hh / b_hh
    out_ref,         # [N, 2d]   f32
    xg_ref,          # scratch [L*Bp, 6d] f32  precomputed input-gate pre-activations
    outf_ref,        # scratch [L*Bp, d]  f32  forward  hidden states (time-major rows)
    outb_ref,        # scratch [L*Bp, d]  f32  backward hidden states
    *, B, Bp, L, d,
):
    f32 = jnp.float32
    bf16 = jnp.bfloat16
    N = node_ref.shape[0]
    LB = L * Bp
    d3 = 3 * d

    node = node_ref[...]                               # [N, d]
    mess = _hardswish(node + bias_ref[...])            # [N, d]

    # ---- initial hidden: per-graph scatter-max of `node` (pad lanes -> 0) --------------------
    batch_col = batch_ref[...]                         # [N, 1]
    h_rows = []
    for b in range(Bp):                                # Bp is a small static int
        if b < B:
            m = batch_col == b
            h_rows.append(jnp.max(jnp.where(m, node, -1e30), axis=0, keepdims=True))
        else:
            h_rows.append(jnp.zeros((1, d), f32))
    h0 = jnp.concatenate(h_rows, axis=0)               # [Bp, d]

    # ---- fused input-gate slab for ALL timesteps & both directions (loop-invariant) ----------
    # xg[row] = mess[src[row]] @ [Wi_f | Wi_b] + [bi_f | bi_b]   (pad rows get bias only, x = 0)
    xm = jnp.dot(mess.astype(bf16), Wi_ref[...], preferred_element_type=f32)        # [N, 6d]
    P = (src_ref[...] == lax.broadcasted_iota(jnp.int32, (LB, N), 1)).astype(bf16)  # [LB, N]
    xg_ref[...] = jnp.dot(P, xm.astype(bf16), preferred_element_type=f32) + bi_ref[...]

    Whf = Whf_ref[...]
    bhf = bhf_ref[...]
    Whb = Whb_ref[...]
    bhb = bhb_ref[...]

    def gru_step(xg, h, Wh, bh):
        # serial recurrence: keep the tiny matmul + gates in f32
        hg = jnp.dot(h, Wh, preferred_element_type=f32) + bh          # [Bp, 3d]
        r = jax.nn.sigmoid(xg[:, :d] + hg[:, :d])
        z = jax.nn.sigmoid(xg[:, d:2 * d] + hg[:, d:2 * d])
        n = jnp.tanh(xg[:, 2 * d:] + r * hg[:, 2 * d:])
        return (1.0 - z) * n + z * h

    def fwd_body(t, h):
        row = pl.multiple_of(t * Bp, Bp)
        blk = xg_ref[pl.ds(row, Bp), :]                                # [Bp, 6d]
        h = gru_step(blk[:, :d3], h, Whf, bhf)
        outf_ref[pl.ds(row, Bp), :] = h
        return h

    def bwd_body(i, h):
        t = L - 1 - i
        row = pl.multiple_of(t * Bp, Bp)
        blk = xg_ref[pl.ds(row, Bp), :]
        h = gru_step(blk[:, d3:], h, Whb, bhb)
        outb_ref[pl.ds(row, Bp), :] = h
        return h

    lax.fori_loop(0, L, fwd_body, h0, unroll=True)
    lax.fori_loop(0, L, bwd_body, h0, unroll=True)

    # ---- seq_to_graph: exact f32 one-hot gather of [h_fwd | h_bwd] back to node rows ---------
    Q = (pos_ref[...] == lax.broadcasted_iota(jnp.int32, (N, LB), 1)).astype(f32)   # [N, LB]
    seq_out = jnp.concatenate([outf_ref[...], outb_ref[...]], axis=-1)              # [LB, 2d]
    out_ref[...] = jnp.dot(Q, seq_out, preferred_element_type=f32)
    # TODO(synk): for production graph sizes, tile over (graph, time) blocks with
    # PrefetchScalarGridSpec (indices in SMEM) so packed buffers stay O(tile*d) under v7x's
    # 64 MiB VMEM and the grid can be sharded ("parallel") across its two TensorCores.


# ----------------------------------------------------------------------------
# Parameters (weights stored [in, out] = PyTorch weight.T; PyTorch-style init)
# ----------------------------------------------------------------------------
def init_params(key, d):
    ks = jax.random.split(key, 9)
    bound = 1.0 / math.sqrt(d)
    u = lambda k, shape: jax.random.uniform(k, shape, jnp.float32, -bound, bound)
    return {
        "bias": (1.0 / math.sqrt(d)) * jax.random.normal(ks[0], (1, d), jnp.float32),
        "Wi_f": u(ks[1], (d, 3 * d)), "Wh_f": u(ks[2], (d, 3 * d)),
        "bi_f": u(ks[3], (1, 3 * d)), "bh_f": u(ks[4], (1, 3 * d)),
        "Wi_b": u(ks[5], (d, 3 * d)), "Wh_b": u(ks[6], (d, 3 * d)),
        "bi_b": u(ks[7], (1, 3 * d)), "bh_b": u(ks[8], (1, 3 * d)),
    }


# ----------------------------------------------------------------------------
# Wrapper calling pallas_call (max_len must be static; pass via functools.partial)
# ----------------------------------------------------------------------------
def cmpnn_gru_pallas(params, node, node_num, *, max_len):
    N, d = node.shape
    B = int(node_num.shape[0])
    L = int(max_len)
    Bp = max(8, ((B + 7) // 8) * 8)      # pad batch to a full sublane group
    LB = L * Bp

    node_num = node_num.astype(jnp.int32)
    offsets = jnp.cumsum(node_num) - node_num                                     # [B]
    batch_idx = jnp.repeat(jnp.arange(B, dtype=jnp.int32), node_num,
                           total_repeat_length=N)                                # [N]
    t_idx = jnp.arange(N, dtype=jnp.int32) - offsets[batch_idx]                  # [N]
    pos = (t_idx * Bp + batch_idx).reshape(N, 1)                                 # packed row of node n

    rows = jnp.arange(LB, dtype=jnp.int32)
    t_of = rows // Bp
    b_of = rows % Bp
    b_clip = jnp.minimum(b_of, B - 1)
    valid = (b_of < B) & (t_of < node_num[b_clip])
    src = jnp.where(valid, offsets[b_clip] + t_of, -1).reshape(LB, 1)            # node feeding each row

    batch_col = batch_idx.reshape(N, 1)

    # fused lane-dense weight/bias slabs (bf16 MXU operands, f32 accumulation in-kernel)
    Wi = jnp.concatenate([params["Wi_f"], params["Wi_b"]], axis=1).astype(jnp.bfloat16)   # [d, 6d]
    bi = jnp.concatenate([params["bi_f"], params["bi_b"]], axis=1)                        # [1, 6d]

    inputs = [node.astype(jnp.float32), src, pos, batch_col,
              params["bias"], Wi, bi,
              params["Wh_f"], params["bh_f"], params["Wh_b"], params["bh_b"]]

    kernel = functools.partial(cmpnn_gru_kernel, B=B, Bp=Bp, L=L, d=d)
    vmem = pl.BlockSpec(memory_space=pltpu.MemorySpace.VMEM)

    out = pl.pallas_call(
        kernel,
        out_shape=jax.ShapeDtypeStruct((N, 2 * d), jnp.float32),
        in_specs=[vmem] * len(inputs),
        out_specs=vmem,
        scratch_shapes=[pltpu.VMEM((LB, 6 * d), jnp.float32),
                        pltpu.VMEM((LB, d), jnp.float32),
                        pltpu.VMEM((LB, d), jnp.float32)],
    )(*inputs)
    return out


# ----------------------------------------------------------------------------
# Pure-JAX f32 reference (graph_to_seq = zero-pad pack, PyTorch GRU equations)
# ----------------------------------------------------------------------------
def cmpnn_gru_reference(params, node, node_num):
    d = node.shape[1]
    counts = [int(x) for x in node_num]
    B, L = len(counts), max(counts)
    hp = jax.lax.Precision.HIGHEST
    mm = lambda a, b: jnp.dot(a, b, precision=hp)

    mess = _hardswish(node + params["bias"])
    seqs, h0_rows, off = [], [], 0
    for n in counts:
        seqs.append(jnp.concatenate([mess[off:off + n],
                                     jnp.zeros((L - n, d), jnp.float32)], axis=0))
        h0_rows.append(jnp.max(node[off:off + n], axis=0))
        off += n
    seq = jnp.stack(seqs)            # [B, L, d]
    h0 = jnp.stack(h0_rows)          # [B, d]

    def run_dir(seq_dir, Wi, bi, Wh, bh):
        h, outs = h0, []
        for t in range(L):
            x = seq_dir[:, t, :]
            xg = mm(x, Wi) + bi
            hg = mm(h, Wh) + bh
            r = jax.nn.sigmoid(xg[:, :d] + hg[:, :d])
            z = jax.nn.sigmoid(xg[:, d:2 * d] + hg[:, d:2 * d])
            nn_ = jnp.tanh(xg[:, 2 * d:] + r * hg[:, 2 * d:])
            h = (1.0 - z) * nn_ + z * h
            outs.append(h)
        return jnp.stack(outs, axis=1)                            # [B, L, d]

    out_f = run_dir(seq, params["Wi_f"], params["bi_f"], params["Wh_f"], params["bh_f"])
    out_b = run_dir(seq[:, ::-1, :], params["Wi_b"], params["bi_b"],
                    params["Wh_b"], params["bh_b"])[:, ::-1, :]
    out = jnp.concatenate([out_f, out_b], axis=-1)                # [B, L, 2d]
    return jnp.concatenate([out[b, :counts[b], :] for b in range(B)], axis=0)


if __name__ == "__main__":
    D_MODEL = 32
    node_num = jnp.array([5, 7, 4], dtype=jnp.int32)      # 3 graphs, 16 nodes total
    N = int(node_num.sum())
    max_len = int(node_num.max())

    key = jax.random.PRNGKey(0)
    k_node, k_par = jax.random.split(key)
    node = jax.random.normal(k_node, (N, D_MODEL), jnp.float32)
    params = init_params(k_par, D_MODEL)

    run = jax.jit(functools.partial(cmpnn_gru_pallas, max_len=max_len))
    out = run(params, node, node_num)
    jax.block_until_ready(out)

    ref = cmpnn_gru_reference(params, node, node_num)
    assert out.shape == (N, 2 * D_MODEL)
    err = float(jnp.max(jnp.abs(out - ref)))
    # bf16 MXU operands on the dense input-projection path (f32 accumulation); 2e-2 covers rounding.
    assert jnp.allclose(out, ref, atol=2e-2, rtol=2e-2), err
    print("KERNEL_OK")
</pallas_src>

<mosaic_0001>
module attributes {stable_mosaic.version = 11 : i64} {
  func.func @cmpnn_gru_kernel(%arg0: memref<16x32xf32, #tpu.memory_space<vmem>>, %arg1: memref<56x1xi32, #tpu.memory_space<vmem>>, %arg2: memref<16x1xi32, #tpu.memory_space<vmem>>, %arg3: memref<16x1xi32, #tpu.memory_space<vmem>>, %arg4: memref<1x32xf32, #tpu.memory_space<vmem>>, %arg5: memref<32x192xbf16, #tpu.memory_space<vmem>>, %arg6: memref<1x192xf32, #tpu.memory_space<vmem>>, %arg7: memref<32x96xf32, #tpu.memory_space<vmem>>, %arg8: memref<1x96xf32, #tpu.memory_space<vmem>>, %arg9: memref<32x96xf32, #tpu.memory_space<vmem>>, %arg10: memref<1x96xf32, #tpu.memory_space<vmem>>, %arg11: memref<16x64xf32, #tpu.memory_space<vmem>>, %arg12: memref<56x192xf32, #tpu.memory_space<vmem>>, %arg13: memref<56x32xf32, #tpu.memory_space<vmem>>, %arg14: memref<56x32xf32, #tpu.memory_space<vmem>>) attributes {dimension_semantics = [], scalar_prefetch = 0 : i64, scratch_operands = 3 : i64, tpu.core_type = #tpu.core_type<tc>} {
    %c0 = arith.constant 0 : index
    %c0_0 = arith.constant 0 : index
    %0 = vector.load %arg0[%c0, %c0_0] : memref<16x32xf32, #tpu.memory_space<vmem>>, vector<16x32xf32>
    %c0_1 = arith.constant 0 : index
    %c0_2 = arith.constant 0 : index
    %1 = vector.load %arg4[%c0_1, %c0_2] : memref<1x32xf32, #tpu.memory_space<vmem>>, vector<1x32xf32>
    %2 = vector.broadcast %1 : vector<1x32xf32> to vector<16x32xf32>
    %3 = arith.addf %0, %2 : vector<16x32xf32>
    %cst = arith.constant 3.000000e+00 : f32
    %4 = vector.broadcast %cst : f32 to vector<16x32xf32>
    %5 = arith.addf %3, %4 : vector<16x32xf32>
    %cst_3 = arith.constant 0.000000e+00 : f32
    %cst_4 = arith.constant 6.000000e+00 : f32
    %6 = vector.broadcast %cst_3 : f32 to vector<16x32xf32>
    %7 = arith.maximumf %6, %5 : vector<16x32xf32>
    %8 = vector.broadcast %cst_4 : f32 to vector<16x32xf32>
    %9 = arith.minimumf %8, %7 : vector<16x32xf32>
    %10 = arith.mulf %3, %9 : vector<16x32xf32>
    %cst_5 = arith.constant 0.166666672 : f32
    %11 = vector.broadcast %cst_5 : f32 to vector<16x32xf32>
    %12 = arith.mulf %10, %11 : vector<16x32xf32>
    %c0_6 = arith.constant 0 : index
    %c0_7 = arith.constant 0 : index
    %13 = vector.load %arg3[%c0_6, %c0_7] : memref<16x1xi32, #tpu.memory_space<vmem>>, vector<16x1xi32>
    %c0_i32 = arith.constant 0 : i32
    %14 = vector.broadcast %c0_i32 : i32 to vector<16x1xi32>
    %15 = arith.cmpi eq, %13, %14 : vector<16x1xi32>
    %cst_8 = arith.constant -1.000000e+30 : f32
    %16 = vector.shape_cast %15 : vector<16x1xi1> to vector<16x1xi1>
    %17 = vector.broadcast %16 : vector<16x1xi1> to vector<16x32xi1>
    %18 = vector.broadcast %cst_8 : f32 to vector<16x32xf32>
    %19 = arith.select %17, %0, %18 : vector<16x32xi1>, vector<16x32xf32>
    %cst_9 = arith.constant dense<0xFF800000> : vector<32xf32>
    %20 = vector.multi_reduction <maximumf>, %19, %cst_9 [0] : vector<16x32xf32> to vector<32xf32>
    %21 = vector.shape_cast %20 : vector<32xf32> to vector<1x32xf32>
    %c1_i32 = arith.constant 1 : i32
    %22 = vector.broadcast %c1_i32 : i32 to vector<16x1xi32>
    %23 = arith.cmpi eq, %13, %22 : vector<16x1xi32>
    %cst_10 = arith.constant -1.000000e+30 : f32
    %24 = vector.shape_cast %23 : vector<16x1xi1> to vector<16x1xi1>
    %25 = vector.broadcast %24 : vector<16x1xi1> to vector<16x32xi1>
    %26 = vector.broadcast %cst_10 : f32 to vector<16x32xf32>
    %27 = arith.select %25, %0, %26 : vector<16x32xi1>, vector<16x32xf32>
    %cst_11 = arith.constant dense<0xFF800000> : vector<32xf32>
    %28 = vector.multi_reduction <maximumf>, %27, %cst_11 [0] : vector<16x32xf32> to vector<32xf32>
    %29 = vector.shape_cast %28 : vector<32xf32> to vector<1x32xf32>
    %c2_i32 = arith.constant 2 : i32
    %30 = vector.broadcast %c2_i32 : i32 to vector<16x1xi32>
    %31 = arith.cmpi eq, %13, %30 : vector<16x1xi32>
    %cst_12 = arith.constant -1.000000e+30 : f32
    %32 = vector.shape_cast %31 : vector<16x1xi1> to vector<16x1xi1>
    %33 = vector.broadcast %32 : vector<16x1xi1> to vector<16x32xi1>
    %34 = vector.broadcast %cst_12 : f32 to vector<16x32xf32>
    %35 = arith.select %33, %0, %34 : vector<16x32xi1>, vector<16x32xf32>
    %cst_13 = arith.constant dense<0xFF800000> : vector<32xf32>
    %36 = vector.multi_reduction <maximumf>, %35, %cst_13 [0] : vector<16x32xf32> to vector<32xf32>
    %37 = vector.shape_cast %36 : vector<32xf32> to vector<1x32xf32>
    %cst_14 = arith.constant 0.000000e+00 : f32
    %38 = vector.broadcast %cst_14 : f32 to vector<1x32xf32>
    %cst_15 = arith.constant 0.000000e+00 : f32
    %39 = vector.broadcast %cst_15 : f32 to vector<1x32xf32>
    %cst_16 = arith.constant 0.000000e+00 : f32
    %40 = vector.broadcast %cst_16 : f32 to vector<1x32xf32>
    %cst_17 = arith.constant 0.000000e+00 : f32
    %41 = vector.broadcast %cst_17 : f32 to vector<1x32xf32>
    %cst_18 = arith.constant 0.000000e+00 : f32
    %42 = vector.broadcast %cst_18 : f32 to vector<1x32xf32>
    %43 = tpu.concatenate %21, %29, %37, %38, %39, %40, %41, %42 in 0 : vector<1x32xf32>, vector<1x32xf32>, vector<1x32xf32>, vector<1x32xf32>, vector<1x32xf32>, vector<1x32xf32>, vector<1x32xf32>, vector<1x32xf32> -> vector<8x32xf32>
    %44 = arith.truncf %12 : vector<16x32xf32> to vector<16x32xbf16>
    %c0_19 = arith.constant 0 : index
    %c0_20 = arith.constant 0 : index
    %45 = vector.load %arg5[%c0_19, %c0_20] : memref<32x192xbf16, #tpu.memory_space<vmem>>, vector<32x192xbf16>
    %cst_21 = arith.constant dense<0.000000e+00> : vector<16x192xf32>
    %46 = tpu.matmul %44, %45, %cst_21 {dimension_numbers = #tpu.dot_dimension_numbers<[1], [0], [0], [1], [0, 0, 1, 1], [], []>} : vector<16x32xbf16>, vector<32x192xbf16>, vector<16x192xf32> -> vector<16x192xf32>
    %c0_22 = arith.constant 0 : index
    %c0_23 = arith.constant 0 : index
    %47 = vector.load %arg1[%c0_22, %c0_23] : memref<56x1xi32, #tpu.memory_space<vmem>>, vector<56x1xi32>
    %48 = tpu.iota {dimensions = array<i32: 1>} : vector<56x16xi32>
    %49 = vector.broadcast %47 : vector<56x1xi32> to vector<56x16xi32>
    %50 = arith.cmpi eq, %49, %48 : vector<56x16xi32>
    %51 = arith.extui %50 : vector<56x16xi1> to vector<56x16xi32>
    %52 = arith.sitofp %51 : vector<56x16xi32> to vector<56x16xf32>
    %53 = arith.truncf %52 : vector<56x16xf32> to vector<56x16xbf16>
    %54 = arith.truncf %46 : vector<16x192xf32> to vector<16x192xbf16>
    %cst_24 = arith.constant dense<0.000000e+00> : vector<56x192xf32>
    %55 = tpu.matmul %53, %54, %cst_24 {dimension_numbers = #tpu.dot_dimension_numbers<[1], [0], [0], [1], [0, 0, 1, 1], [], []>} : vector<56x16xbf16>, vector<16x192xbf16>, vector<56x192xf32> -> vector<56x192xf32>
    %c0_25 = arith.constant 0 : index
    %c0_26 = arith.constant 0 : index
    %56 = vector.load %arg6[%c0_25, %c0_26] : memref<1x192xf32, #tpu.memory_space<vmem>>, vector<1x192xf32>
    %57 = vector.broadcast %56 : vector<1x192xf32> to vector<56x192xf32>
    %58 = arith.addf %55, %57 : vector<56x192xf32>
    %c0_27 = arith.constant 0 : index
    %c0_28 = arith.constant 0 : index
    %59 = vector.load %arg12[%c0_27, %c0_28] : memref<56x192xf32, #tpu.memory_space<vmem>>, vector<56x192xf32>
    tpu.vector_store %arg12[%c0_27, %c0_28], %58 {strides = array<i32>} : memref<56x192xf32, #tpu.memory_space<vmem>>, vector<56x192xf32>,
    %c0_29 = arith.constant 0 : index
    %c0_30 = arith.constant 0 : index
    %60 = vector.load %arg7[%c0_29, %c0_30] : memref<32x96xf32, #tpu.memory_space<vmem>>, vector<32x96xf32>
    %c0_31 = arith.constant 0 : index
    %c0_32 = arith.constant 0 : index
    %61 = vector.load %arg8[%c0_31, %c0_32] : memref<1x96xf32, #tpu.memory_space<vmem>>, vector<1x96xf32>
    %c0_33 = arith.constant 0 : index
    %c0_34 = arith.constant 0 : index
    %62 = vector.load %arg9[%c0_33, %c0_34] : memref<32x96xf32, #tpu.memory_space<vmem>>, vector<32x96xf32>
    %c0_35 = arith.constant 0 : index
    %c0_36 = arith.constant 0 : index
    %63 = vector.load %arg10[%c0_35, %c0_36] : memref<1x96xf32, #tpu.memory_space<vmem>>, vector<1x96xf32>
    %c0_i32_37 = arith.constant 0 : i32
    %c8_i32 = arith.constant 8 : i32
    %64 = arith.muli %c0_i32_37, %c8_i32 : i32
    %65 = tpu.assume_multiple %64, 8 : i32
    %66 = arith.index_cast %65 : i32 to index
    %c0_38 = arith.constant 0 : index
    %67 = vector.load %arg12[%66, %c0_38] : memref<56x192xf32, #tpu.memory_space<vmem>>, vector<8x192xf32>
    %68 = vector.extract_strided_slice %67 {offsets = [0, 0], sizes = [8, 96], strides = [1, 1]} : vector<8x192xf32> to vector<8x96xf32>
    %cst_39 = arith.constant dense<0.000000e+00> : vector<8x96xf32>
    %69 = tpu.matmul %43, %60, %cst_39 {dimension_numbers = #tpu.dot_dimension_numbers<[1], [0], [0], [1], [0, 0, 1, 1], [], []>} : vector<8x32xf32>, vector<32x96xf32>, vector<8x96xf32> -> vector<8x96xf32>
    %70 = vector.broadcast %61 : vector<1x96xf32> to vector<8x96xf32>
    %71 = arith.addf %69, %70 : vector<8x96xf32>
    %72 = vector.extract_strided_slice %68 {offsets = [0, 0], sizes = [8, 32], strides = [1, 1]} : vector<8x96xf32> to vector<8x32xf32>
    %73 = vector.extract_strided_slice %71 {offsets = [0, 0], sizes = [8, 32], strides = [1, 1]} : vector<8x96xf32> to vector<8x32xf32>
    %74 = arith.addf %72, %73 : vector<8x32xf32>
    %75 = arith.negf %74 : vector<8x32xf32>
    %76 = math.exp %75 : vector<8x32xf32>
    %cst_40 = arith.constant 1.000000e+00 : f32
    %77 = vector.broadcast %cst_40 : f32 to vector<8x32xf32>
    %78 = arith.addf %77, %76 : vector<8x32xf32>
    %79 = arith.divf %77, %78 : vector<8x32xf32>
    %80 = vector.extract_strided_slice %68 {offsets = [0, 32], sizes = [8, 32], strides = [1, 1]} : vector<8x96xf32> to vector<8x32xf32>
    %81 = vector.extract_strided_slice %71 {offsets = [0, 32], sizes = [8, 32], strides = [1, 1]} : vector<8x96xf32> to vector<8x32xf32>
    %82 = arith.addf %80, %81 : vector<8x32xf32>
    %83 = arith.negf %82 : vector<8x32xf32>
    %84 = math.exp %83 : vector<8x32xf32>
    %cst_41 = arith.constant 1.000000e+00 : f32
    %85 = vector.broadcast %cst_41 : f32 to vector<8x32xf32>
    %86 = arith.addf %85, %84 : vector<8x32xf32>
    %87 = arith.divf %85, %86 : vector<8x32xf32>
    %88 = vector.extract_strided_slice %68 {offsets = [0, 64], sizes = [8, 32], strides = [1, 1]} : vector<8x96xf32> to vector<8x32xf32>
    %89 = vector.extract_strided_slice %71 {offsets = [0, 64], sizes = [8, 32], strides = [1, 1]} : vector<8x96xf32> to vector<8x32xf32>
    %90 = arith.mulf %79, %89 : vector<8x32xf32>
    %91 = arith.addf %88, %90 : vector<8x32xf32>
    %92 = math.tanh %91 : vector<8x32xf32>
    %cst_42 = arith.constant 1.000000e+00 : f32
    %93 = vector.broadcast %cst_42 : f32 to vector<8x32xf32>
    %94 = arith.subf %93, %87 : vector<8x32xf32>
    %95 = arith.mulf %94, %92 : vector<8x32xf32>
    %96 = arith.mulf %87, %43 : vector<8x32xf32>
    %97 = arith.addf %95, %96 : vector<8x32xf32>
    %98 = arith.index_cast %65 : i32 to index
    %c0_43 = arith.constant 0 : index
    %99 = vector.load %arg13[%98, %c0_43] : memref<56x32xf32, #tpu.memory_space<vmem>>, vector<8x32xf32>
    tpu.vector_store %arg13[%98, %c0_43], %97 {strides = array<i32>} : memref<56x32xf32, #tpu.memory_space<vmem>>, vector<8x32xf32>,
    %c1_i32_44 = arith.constant 1 : i32
    %c8_i32_45 = arith.constant 8 : i32
    %100 = arith.muli %c1_i32_44, %c8_i32_45 : i32
    %101 = tpu.assume_multiple %100, 8 : i32
    %102 = arith.index_cast %101 : i32 to index
    %c0_46 = arith.constant 0 : index
    %103 = vector.load %arg12[%102, %c0_46] : memref<56x192xf32, #tpu.memory_space<vmem>>, vector<8x192xf32>
    %104 = vector.extract_strided_slice %103 {offsets = [0, 0], sizes = [8, 96], strides = [1, 1]} : vector<8x192xf32> to vector<8x96xf32>
    %cst_47 = arith.constant dense<0.000000e+00> : vector<8x96xf32>
    %105 = tpu.matmul %97, %60, %cst_47 {dimension_numbers = #tpu.dot_dimension_numbers<[1], [0], [0], [1], [0, 0, 1, 1], [], []>} : vector<8x32xf32>, vector<32x96xf32>, vector<8x96xf32> -> vector<8x96xf32>
    %106 = vector.broadcast %61 : vector<1x96xf32> to vector<8x96xf32>
    %107 = arith.addf %105, %106 : vector<8x96xf32>
    %108 = vector.extract_strided_slice %104 {offsets = [0, 0], sizes = [8, 32], strides = [1, 1]} : vector<8x96xf32> to vector<8x32xf32>
    %109 = vector.extract_strided_slice %107 {offsets = [0, 0], sizes = [8, 32], strides = [1, 1]} : vector<8x96xf32> to vector<8x32xf32>
    %110 = arith.addf %108, %109 : vector<8x32xf32>
    %111 = arith.negf %110 : vector<8x32xf32>
    %112 = math.exp %111 : vector<8x32xf32>
    %cst_48 = arith.constant 1.000000e+00 : f32
    %113 = vector.broadcast %cst_48 : f32 to vector<8x32xf32>
    %114 = arith.addf %113, %112 : vector<8x32xf32>
    %115 = arith.divf %113, %114 : vector<8x32xf32>
    %116 = vector.extract_strided_slice %104 {offsets = [0, 32], sizes = [8, 32], strides = [1, 1]} : vector<8x96xf32> to vector<8x32xf32>
    %117 = vector.extract_strided_slice %107 {offsets = [0, 32], sizes = [8, 32], strides = [1, 1]} : vector<8x96xf32> to vector<8x32xf32>
    %118 = arith.addf %116, %117 : vector<8x32xf32>
    %119 = arith.negf %118 : vector<8x32xf32>
    %120 = math.exp %119 : vector<8x32xf32>
    %cst_49 = arith.constant 1.000000e+00 : f32
    %121 = vector.broadcast %cst_49 : f32 to vector<8x32xf32>
    %122 = arith.addf %121, %120 : vector<8x32xf32>
    %123 = arith.divf %121, %122 : vector<8x32xf32>
    %124 = vector.extract_strided_slice %104 {offsets = [0, 64], sizes = [8, 32], strides = [1, 1]} : vector<8x96xf32> to vector<8x32xf32>
    %125 = vector.extract_strided_slice %107 {offsets = [0, 64], sizes = [8, 32], strides = [1, 1]} : vector<8x96xf32> to vector<8x32xf32>
    %126 = arith.mulf %115, %125 : vector<8x32xf32>
    %127 = arith.addf %124, %126 : vector<8x32xf32>
    %128 = math.tanh %127 : vector<8x32xf32>
    %cst_50 = arith.constant 1.000000e+00 : f32
    %129 = vector.broadcast %cst_50 : f32 to vector<8x32xf32>
    %130 = arith.subf %129, %123 : vector<8x32xf32>
    %131 = arith.mulf %130, %128 : vector<8x32xf32>
    %132 = arith.mulf %123, %97 : vector<8x32xf32>
    %133 = arith.addf %131, %132 : vector<8x32xf32>
    %134 = arith.index_cast %101 : i32 to index
    %c0_51 = arith.constant 0 : index
    %135 = vector.load %arg13[%134, %c0_51] : memref<56x32xf32, #tpu.memory_space<vmem>>, vector<8x32xf32>
    tpu.vector_store %arg13[%134, %c0_51], %133 {strides = array<i32>} : memref<56x32xf32, #tpu.memory_space<vmem>>, vector<8x32xf32>,
    %c2_i32_52 = arith.constant 2 : i32
    %c8_i32_53 = arith.constant 8 : i32
    %136 = arith.muli %c2_i32_52, %c8_i32_53 : i32
    %137 = tpu.assume_multiple %136, 8 : i32
    %138 = arith.index_cast %137 : i32 to index
    %c0_54 = arith.constant 0 : index
    %139 = vector.load %arg12[%138, %c0_54] : memref<56x192xf32, #tpu.memory_space<vmem>>, vector<8x192xf32>
    %140 = vector.extract_strided_slice %139 {offsets = [0, 0], sizes = [8, 96], strides = [1, 1]} : vector<8x192xf32> to vector<8x96xf32>
    %cst_55 = arith.constant dense<0.000000e+00> : vector<8x96xf32>
    %141 = tpu.matmul %133, %60, %cst_55 {dimension_numbers = #tpu.dot_dimension_numbers<[1], [0], [0], [1], [0, 0, 1, 1], [], []>} : vector<8x32xf32>, vector<32x96xf32>, vector<8x96xf32> -> vector<8x96xf32>
    %142 = vector.broadcast %61 : vector<1x96xf32> to vector<8x96xf32>
    %143 = arith.addf %141, %142 : vector<8x96xf32>
    %144 = vector.extract_strided_slice %140 {offsets = [0, 0], sizes = [8, 32], strides = [1, 1]} : vector<8x96xf32> to vector<8x32xf32>
    %145 = vector.extract_strided_slice %143 {offsets = [0, 0], sizes = [8, 32], strides = [1, 1]} : vector<8x96xf32> to vector<8x32xf32>
    %146 = arith.addf %144, %145 : vector<8x32xf32>
    %147 = arith.negf %146 : vector<8x32xf32>
    %148 = math.exp %147 : vector<8x32xf32>
    %cst_56 = arith.constant 1.000000e+00 : f32
    %149 = vector.broadcast %cst_56 : f32 to vector<8x32xf32>
    %150 = arith.addf %149, %148 : vector<8x32xf32>
    %151 = arith.divf %149, %150 : vector<8x32xf32>
    %152 = vector.extract_strided_slice %140 {offsets = [0, 32], sizes = [8, 32], strides = [1, 1]} : vector<8x96xf32> to vector<8x32xf32>
    %153 = vector.extract_strided_slice %143 {offsets = [0, 32], sizes = [8, 32], strides = [1, 1]} : vector<8x96xf32> to vector<8x32xf32>
    %154 = arith.addf %152, %153 : vector<8x32xf32>
    %155 = arith.negf %154 : vector<8x32xf32>
    %156 = math.exp %155 : vector<8x32xf32>
    %cst_57 = arith.constant 1.000000e+00 : f32
    %157 = vector.broadcast %cst_57 : f32 to vector<8x32xf32>
    %158 = arith.addf %157, %156 : vector<8x32xf32>
    %159 = arith.divf %157, %158 : vector<8x32xf32>
    %160 = vector.extract_strided_slice %140 {offsets = [0, 64], sizes = [8, 32], strides = [1, 1]} : vector<8x96xf32> to vector<8x32xf32>
    %161 = vector.extract_strided_slice %143 {offsets = [0, 64], sizes = [8, 32], strides = [1, 1]} : vector<8x96xf32> to vector<8x32xf32>
    %162 = arith.mulf %151, %161 : vector<8x32xf32>
    %163 = arith.addf %160, %162 : vector<8x32xf32>
    %164 = math.tanh %163 : vector<8x32xf32>
    %cst_58 = arith.constant 1.000000e+00 : f32
    %165 = vector.broadcast %cst_58 : f32 to vector<8x32xf32>
    %166 = arith.subf %165, %159 : vector<8x32xf32>
    %167 = arith.mulf %166, %164 : vector<8x32xf32>
    %168 = arith.mulf %159, %133 : vector<8x32xf32>
    %169 = arith.addf %167, %168 : vector<8x32xf32>
    %170 = arith.index_cast %137 : i32 to index
    %c0_59 = arith.constant 0 : index
    %171 = vector.load %arg13[%170, %c0_59] : memref<56x32xf32, #tpu.memory_space<vmem>>, vector<8x32xf32>
    tpu.vector_store %arg13[%170, %c0_59], %169 {strides = array<i32>} : memref<56x32xf32, #tpu.memory_space<vmem>>, vector<8x32xf32>,
    %c3_i32 = arith.constant 3 : i32
    %c8_i32_60 = arith.constant 8 : i32
    %172 = arith.muli %c3_i32, %c8_i32_60 : i32
    %173 = tpu.assume_multiple %172, 8 : i32
    %174 = arith.index_cast %173 : i32 to index
    %c0_61 = arith.constant 0 : index
    %175 = vector.load %arg12[%174, %c0_61] : memref<56x192xf32, #tpu.memory_space<vmem>>, vector<8x192xf32>
    %176 = vector.extract_strided_slice %175 {offsets = [0, 0], sizes = [8, 96], strides = [1, 1]} : vector<8x192xf32> to vector<8x96xf32>
    %cst_62 = arith.constant dense<0.000000e+00> : vector<8x96xf32>
    %177 = tpu.matmul %169, %60, %cst_62 {dimension_numbers = #tpu.dot_dimension_numbers<[1], [0], [0], [1], [0, 0, 1, 1], [], []>} : vector<8x32xf32>, vector<32x96xf32>, vector<8x96xf32> -> vector<8x96xf32>
    %178 = vector.broadcast %61 : vector<1x96xf32> to vector<8x96xf32>
    %179 = arith.addf %177, %178 : vector<8x96xf32>
    %180 = vector.extract_strided_slice %176 {offsets = [0, 0], sizes = [8, 32], strides = [1, 1]} : vector<8x96xf32> to vector<8x32xf32>
    %181 = vector.extract_strided_slice %179 {offsets = [0, 0], sizes = [8, 32], strides = [1, 1]} : vector<8x96xf32> to vector<8x32xf32>
    %182 = arith.addf %180, %181 : vector<8x32xf32>
    %183 = arith.negf %182 : vector<8x32xf32>
    %184 = math.exp %183 : vector<8x32xf32>
    %cst_63 = arith.constant 1.000000e+00 : f32
    %185 = vector.broadcast %cst_63 : f32 to vector<8x32xf32>
    %186 = arith.addf %185, %184 : vector<8x32xf32>
    %187 = arith.divf %185, %186 : vector<8x32xf32>
    %188 = vector.extract_strided_slice %176 {offsets = [0, 32], sizes = [8, 32], strides = [1, 1]} : vector<8x96xf32> to vector<8x32xf32>
    %189 = vector.extract_strided_slice %179 {offsets = [0, 32], sizes = [8, 32], strides = [1, 1]} : vector<8x96xf32> to vector<8x32xf32>
    %190 = arith.addf %188, %189 : vector<8x32xf32>
    %191 = arith.negf %190 : vector<8x32xf32>
    %192 = math.exp %191 : vector<8x32xf32>
    %cst_64 = arith.constant 1.000000e+00 : f32
    %193 = vector.broadcast %cst_64 : f32 to vector<8x32xf32>
    %194 = arith.addf %193, %192 : vector<8x32xf32>
    %195 = arith.divf %193, %194 : vector<8x32xf32>
    %196 = vector.extract_strided_slice %176 {offsets = [0, 64], sizes = [8, 32], strides = [1, 1]} : vector<8x96xf32> to vector<8x32xf32>
    %197 = vector.extract_strided_slice %179 {offsets = [0, 64], sizes = [8, 32], strides = [1, 1]} : vector<8x96xf32> to vector<8x32xf32>
    %198 = arith.mulf %187, %197 : vector<8x32xf32>
    %199 = arith.addf %196, %198 : vector<8x32xf32>
    %200 = math.tanh %199 : vector<8x32xf32>
    %cst_65 = arith.constant 1.000000e+00 : f32
    %201 = vector.broadcast %cst_65 : f32 to vector<8x32xf32>
    %202 = arith.subf %201, %195 : vector<8x32xf32>
    %203 = arith.mulf %202, %200 : vector<8x32xf32>
    %204 = arith.mulf %195, %169 : vector<8x32xf32>
    %205 = arith.addf %203, %204 : vector<8x32xf32>
    %206 = arith.index_cast %173 : i32 to index
    %c0_66 = arith.constant 0 : index
    %207 = vector.load %arg13[%206, %c0_66] : memref<56x32xf32, #tpu.memory_space<vmem>>, vector<8x32xf32>
    tpu.vector_store %arg13[%206, %c0_66], %205 {strides = array<i32>} : memref<56x32xf32, #tpu.memory_space<vmem>>, vector<8x32xf32>,
    %c4_i32 = arith.constant 4 : i32
    %c8_i32_67 = arith.constant 8 : i32
    %208 = arith.muli %c4_i32, %c8_i32_67 : i32
    %209 = tpu.assume_multiple %208, 8 : i32
    %210 = arith.index_cast %209 : i32 to index
    %c0_68 = arith.constant 0 : index
    %211 = vector.load %arg12[%210, %c0_68] : memref<56x192xf32, #tpu.memory_space<vmem>>, vector<8x192xf32>
    %212 = vector.extract_strided_slice %211 {offsets = [0, 0], sizes = [8, 96], strides = [1, 1]} : vector<8x192xf32> to vector<8x96xf32>
    %cst_69 = arith.constant dense<0.000000e+00> : vector<8x96xf32>
    %213 = tpu.matmul %205, %60, %cst_69 {dimension_numbers = #tpu.dot_dimension_numbers<[1], [0], [0], [1], [0, 0, 1, 1], [], []>} : vector<8x32xf32>, vector<32x96xf32>, vector<8x96xf32> -> vector<8x96xf32>
    %214 = vector.broadcast %61 : vector<1x96xf32> to vector<8x96xf32>
    %215 = arith.addf %213, %214 : vector<8x96xf32>
    %216 = vector.extract_strided_slice %212 {offsets = [0, 0], sizes = [8, 32], strides = [1, 1]} : vector<8x96xf32> to vector<8x32xf32>
    %217 = vector.extract_strided_slice %215 {offsets = [0, 0], sizes = [8, 32], strides = [1, 1]} : vector<8x96xf32> to vector<8x32xf32>
    %218 = arith.addf %216, %217 : vector<8x32xf32>
    %219 = arith.negf %218 : vector<8x32xf32>
    %220 = math.exp %219 : vector<8x32xf32>
    %cst_70 = arith.constant 1.000000e+00 : f32
    %221 = vector.broadcast %cst_70 : f32 to vector<8x32xf32>
    %222 = arith.addf %221, %220 : vector<8x32xf32>
    %223 = arith.divf %221, %222 : vector<8x32xf32>
    %224 = vector.extract_strided_slice %212 {offsets = [0, 32], sizes = [8, 32], strides = [1, 1]} : vector<8x96xf32> to vector<8x32xf32>
    %225 = vector.extract_strided_slice %215 {offsets = [0, 32], sizes = [8, 32], strides = [1, 1]} : vector<8x96xf32> to vector<8x32xf32>
    %226 = arith.addf %224, %225 : vector<8x32xf32>
    %227 = arith.negf %226 : vector<8x32xf32>
    %228 = math.exp %227 : vector<8x32xf32>
    %cst_71 = arith.constant 1.000000e+00 : f32
    %229 = vector.broadcast %cst_71 : f32 to vector<8x32xf32>
    %230 = arith.addf %229, %228 : vector<8x32xf32>
    %231 = arith.divf %229, %230 : vector<8x32xf32>
    %232 = vector.extract_strided_slice %212 {offsets = [0, 64], sizes = [8, 32], strides = [1, 1]} : vector<8x96xf32> to vector<8x32xf32>
    %233 = vector.extract_strided_slice %215 {offsets = [0, 64], sizes = [8, 32], strides = [1, 1]} : vector<8x96xf32> to vector<8x32xf32>
    %234 = arith.mulf %223, %233 : vector<8x32xf32>
    %235 = arith.addf %232, %234 : vector<8x32xf32>
    %236 = math.tanh %235 : vector<8x32xf32>
    %cst_72 = arith.constant 1.000000e+00 : f32
    %237 = vector.broadcast %cst_72 : f32 to vector<8x32xf32>
    %238 = arith.subf %237, %231 : vector<8x32xf32>
    %239 = arith.mulf %238, %236 : vector<8x32xf32>
    %240 = arith.mulf %231, %205 : vector<8x32xf32>
    %241 = arith.addf %239, %240 : vector<8x32xf32>
    %242 = arith.index_cast %209 : i32 to index
    %c0_73 = arith.constant 0 : index
    %243 = vector.load %arg13[%242, %c0_73] : memref<56x32xf32, #tpu.memory_space<vmem>>, vector<8x32xf32>
    tpu.vector_store %arg13[%242, %c0_73], %241 {strides = array<i32>} : memref<56x32xf32, #tpu.memory_space<vmem>>, vector<8x32xf32>,
    %c5_i32 = arith.constant 5 : i32
    %c8_i32_74 = arith.constant 8 : i32
    %244 = arith.muli %c5_i32, %c8_i32_74 : i32
    %245 = tpu.assume_multiple %244, 8 : i32
    %246 = arith.index_cast %245 : i32 to index
    %c0_75 = arith.constant 0 : index
    %247 = vector.load %arg12[%246, %c0_75] : memref<56x192xf32, #tpu.memory_space<vmem>>, vector<8x192xf32>
    %248 = vector.extract_strided_slice %247 {offsets = [0, 0], sizes = [8, 96], strides = [1, 1]} : vector<8x192xf32> to vector<8x96xf32>
    %cst_76 = arith.constant dense<0.000000e+00> : vector<8x96xf32>
    %249 = tpu.matmul %241, %60, %cst_76 {dimension_numbers = #tpu.dot_dimension_numbers<[1], [0], [0], [1], [0, 0, 1, 1], [], []>} : vector<8x32xf32>, vector<32x96xf32>, vector<8x96xf32> -> vector<8x96xf32>
    %250 = vector.broadcast %61 : vector<1x96xf32> to vector<8x96xf32>
    %251 = arith.addf %249, %250 : vector<8x96xf32>
    %252 = vector.extract_strided_slice %248 {offsets = [0, 0], sizes = [8, 32], strides = [1, 1]} : vector<8x96xf32> to vector<8x32xf32>
    %253 = vector.extract_strided_slice %251 {offsets = [0, 0], sizes = [8, 32], strides = [1, 1]} : vector<8x96xf32> to vector<8x32xf32>
    %254 = arith.addf %252, %253 : vector<8x32xf32>
    %255 = arith.negf %254 : vector<8x32xf32>
    %256 = math.exp %255 : vector<8x32xf32>
    %cst_77 = arith.constant 1.000000e+00 : f32
    %257 = vector.broadcast %cst_77 : f32 to vector<8x32xf32>
    %258 = arith.addf %257, %256 : vector<8x32xf32>
    %259 = arith.divf %257, %258 : vector<8x32xf32>
    %260 = vector.extract_strided_slice %248 {offsets = [0, 32], sizes = [8, 32], strides = [1, 1]} : vector<8x96xf32> to vector<8x32xf32>
    %261 = vector.extract_strided_slice %251 {offsets = [0, 32], sizes = [8, 32], strides = [1, 1]} : vector<8x96xf32> to vector<8x32xf32>
    %262 = arith.addf %260, %261 : vector<8x32xf32>
    %263 = arith.negf %262 : vector<8x32xf32>
    %264 = math.exp %263 : vector<8x32xf32>
    %cst_78 = arith.constant 1.000000e+00 : f32
    %265 = vector.broadcast %cst_78 : f32 to vector<8x32xf32>
    %266 = arith.addf %265, %264 : vector<8x32xf32>
    %267 = arith.divf %265, %266 : vector<8x32xf32>
    %268 = vector.extract_strided_slice %248 {offsets = [0, 64], sizes = [8, 32], strides = [1, 1]} : vector<8x96xf32> to vector<8x32xf32>
    %269 = vector.extract_strided_slice %251 {offsets = [0, 64], sizes = [8, 32], strides = [1, 1]} : vector<8x96xf32> to vector<8x32xf32>
    %270 = arith.mulf %259, %269 : vector<8x32xf32>
    %271 = arith.addf %268, %270 : vector<8x32xf32>
    %272 = math.tanh %271 : vector<8x32xf32>
    %cst_79 = arith.constant 1.000000e+00 : f32
    %273 = vector.broadcast %cst_79 : f32 to vector<8x32xf32>
    %274 = arith.subf %273, %267 : vector<8x32xf32>
    %275 = arith.mulf %274, %272 : vector<8x32xf32>
    %276 = arith.mulf %267, %241 : vector<8x32xf32>
    %277 = arith.addf %275, %276 : vector<8x32xf32>
    %278 = arith.index_cast %245 : i32 to index
    %c0_80 = arith.constant 0 : index
    %279 = vector.load %arg13[%278, %c0_80] : memref<56x32xf32, #tpu.memory_space<vmem>>, vector<8x32xf32>
    tpu.vector_store %arg13[%278, %c0_80], %277 {strides = array<i32>} : memref<56x32xf32, #tpu.memory_space<vmem>>, vector<8x32xf32>,
    %c6_i32 = arith.constant 6 : i32
    %c8_i32_81 = arith.constant 8 : i32
    %280 = arith.muli %c6_i32, %c8_i32_81 : i32
    %281 = tpu.assume_multiple %280, 8 : i32
    %282 = arith.index_cast %281 : i32 to index
    %c0_82 = arith.constant 0 : index
    %283 = vector.load %arg12[%282, %c0_82] : memref<56x192xf32, #tpu.memory_space<vmem>>, vector<8x192xf32>
    %284 = vector.extract_strided_slice %283 {offsets = [0, 0], sizes = [8, 96], strides = [1, 1]} : vector<8x192xf32> to vector<8x96xf32>
    %cst_83 = arith.constant dense<0.000000e+00> : vector<8x96xf32>
    %285 = tpu.matmul %277, %60, %cst_83 {dimension_numbers = #tpu.dot_dimension_numbers<[1], [0], [0], [1], [0, 0, 1, 1], [], []>} : vector<8x32xf32>, vector<32x96xf32>, vector<8x96xf32> -> vector<8x96xf32>
    %286 = vector.broadcast %61 : vector<1x96xf32> to vector<8x96xf32>
    %287 = arith.addf %285, %286 : vector<8x96xf32>
    %288 = vector.extract_strided_slice %284 {offsets = [0, 0], sizes = [8, 32], strides = [1, 1]} : vector<8x96xf32> to vector<8x32xf32>
    %289 = vector.extract_strided_slice %287 {offsets = [0, 0], sizes = [8, 32], strides = [1, 1]} : vector<8x96xf32> to vector<8x32xf32>
    %290 = arith.addf %288, %289 : vector<8x32xf32>
    %291 = arith.negf %290 : vector<8x32xf32>
    %292 = math.exp %291 : vector<8x32xf32>
    %cst_84 = arith.constant 1.000000e+00 : f32
    %293 = vector.broadcast %cst_84 : f32 to vector<8x32xf32>
    %294 = arith.addf %293, %292 : vector<8x32xf32>
    %295 = arith.divf %293, %294 : vector<8x32xf32>
    %296 = vector.extract_strided_slice %284 {offsets = [0, 32], sizes = [8, 32], strides = [1, 1]} : vector<8x96xf32> to vector<8x32xf32>
    %297 = vector.extract_strided_slice %287 {offsets = [0, 32], sizes = [8, 32], strides = [1, 1]} : vector<8x96xf32> to vector<8x32xf32>
    %298 = arith.addf %296, %297 : vector<8x32xf32>
    %299 = arith.negf %298 : vector<8x32xf32>
    %300 = math.exp %299 : vector<8x32xf32>
    %cst_85 = arith.constant 1.000000e+00 : f32
    %301 = vector.broadcast %cst_85 : f32 to vector<8x32xf32>
    %302 = arith.addf %301, %300 : vector<8x32xf32>
    %303 = arith.divf %301, %302 : vector<8x32xf32>
    %304 = vector.extract_strided_slice %284 {offsets = [0, 64], sizes = [8, 32], strides = [1, 1]} : vector<8x96xf32> to vector<8x32xf32>
    %305 = vector.extract_strided_slice %287 {offsets = [0, 64], sizes = [8, 32], strides = [1, 1]} : vector<8x96xf32> to vector<8x32xf32>
    %306 = arith.mulf %295, %305 : vector<8x32xf32>
    %307 = arith.addf %304, %306 : vector<8x32xf32>
    %308 = math.tanh %307 : vector<8x32xf32>
    %cst_86 = arith.constant 1.000000e+00 : f32
    %309 = vector.broadcast %cst_86 : f32 to vector<8x32xf32>
    %310 = arith.subf %309, %303 : vector<8x32xf32>
    %311 = arith.mulf %310, %308 : vector<8x32xf32>
    %312 = arith.mulf %303, %277 : vector<8x32xf32>
    %313 = arith.addf %311, %312 : vector<8x32xf32>
    %314 = arith.index_cast %281 : i32 to index
    %c0_87 = arith.constant 0 : index
    %315 = vector.load %arg13[%314, %c0_87] : memref<56x32xf32, #tpu.memory_space<vmem>>, vector<8x32xf32>
    tpu.vector_store %arg13[%314, %c0_87], %313 {strides = array<i32>} : memref<56x32xf32, #tpu.memory_space<vmem>>, vector<8x32xf32>,
    %c7_i32 = arith.constant 7 : i32
    %c0_i32_88 = arith.constant 0 : i32
    %c6_i32_89 = arith.constant 6 : i32
    %316 = arith.subi %c6_i32_89, %c0_i32_88 : i32
    %c8_i32_90 = arith.constant 8 : i32
    %317 = arith.muli %316, %c8_i32_90 : i32
    %318 = tpu.assume_multiple %317, 8 : i32
    %319 = arith.index_cast %318 : i32 to index
    %c0_91 = arith.constant 0 : index
    %320 = vector.load %arg12[%319, %c0_91] : memref<56x192xf32, #tpu.memory_space<vmem>>, vector<8x192xf32>
    %321 = vector.extract_strided_slice %320 {offsets = [0, 96], sizes = [8, 96], strides = [1, 1]} : vector<8x192xf32> to vector<8x96xf32>
    %cst_92 = arith.constant dense<0.000000e+00> : vector<8x96xf32>
    %322 = tpu.matmul %43, %62, %cst_92 {dimension_numbers = #tpu.dot_dimension_numbers<[1], [0], [0], [1], [0, 0, 1, 1], [], []>} : vector<8x32xf32>, vector<32x96xf32>, vector<8x96xf32> -> vector<8x96xf32>
    %323 = vector.broadcast %63 : vector<1x96xf32> to vector<8x96xf32>
    %324 = arith.addf %322, %323 : vector<8x96xf32>
    %325 = vector.extract_strided_slice %321 {offsets = [0, 0], sizes = [8, 32], strides = [1, 1]} : vector<8x96xf32> to vector<8x32xf32>
    %326 = vector.extract_strided_slice %324 {offsets = [0, 0], sizes = [8, 32], strides = [1, 1]} : vector<8x96xf32> to vector<8x32xf32>
    %327 = arith.addf %325, %326 : vector<8x32xf32>
    %328 = arith.negf %327 : vector<8x32xf32>
    %329 = math.exp %328 : vector<8x32xf32>
    %cst_93 = arith.constant 1.000000e+00 : f32
    %330 = vector.broadcast %cst_93 : f32 to vector<8x32xf32>
    %331 = arith.addf %330, %329 : vector<8x32xf32>
    %332 = arith.divf %330, %331 : vector<8x32xf32>
    %333 = vector.extract_strided_slice %321 {offsets = [0, 32], sizes = [8, 32], strides = [1, 1]} : vector<8x96xf32> to vector<8x32xf32>
    %334 = vector.extract_strided_slice %324 {offsets = [0, 32], sizes = [8, 32], strides = [1, 1]} : vector<8x96xf32> to vector<8x32xf32>
    %335 = arith.addf %333, %334 : vector<8x32xf32>
    %336 = arith.negf %335 : vector<8x32xf32>
    %337 = math.exp %336 : vector<8x32xf32>
    %cst_94 = arith.constant 1.000000e+00 : f32
    %338 = vector.broadcast %cst_94 : f32 to vector<8x32xf32>
    %339 = arith.addf %338, %337 : vector<8x32xf32>
    %340 = arith.divf %338, %339 : vector<8x32xf32>
    %341 = vector.extract_strided_slice %321 {offsets = [0, 64], sizes = [8, 32], strides = [1, 1]} : vector<8x96xf32> to vector<8x32xf32>
    %342 = vector.extract_strided_slice %324 {offsets = [0, 64], sizes = [8, 32], strides = [1, 1]} : vector<8x96xf32> to vector<8x32xf32>
    %343 = arith.mulf %332, %342 : vector<8x32xf32>
    %344 = arith.addf %341, %343 : vector<8x32xf32>
    %345 = math.tanh %344 : vector<8x32xf32>
    %cst_95 = arith.constant 1.000000e+00 : f32
    %346 = vector.broadcast %cst_95 : f32 to vector<8x32xf32>
    %347 = arith.subf %346, %340 : vector<8x32xf32>
    %348 = arith.mulf %347, %345 : vector<8x32xf32>
    %349 = arith.mulf %340, %43 : vector<8x32xf32>
    %350 = arith.addf %348, %349 : vector<8x32xf32>
    %351 = arith.index_cast %318 : i32 to index
    %c0_96 = arith.constant 0 : index
    %352 = vector.load %arg14[%351, %c0_96] : memref<56x32xf32, #tpu.memory_space<vmem>>, vector<8x32xf32>
    tpu.vector_store %arg14[%351, %c0_96], %350 {strides = array<i32>} : memref<56x32xf32, #tpu.memory_space<vmem>>, vector<8x32xf32>,
    %c1_i32_97 = arith.constant 1 : i32
    %c6_i32_98 = arith.constant 6 : i32
    %353 = arith.subi %c6_i32_98, %c1_i32_97 : i32
    %c8_i32_99 = arith.constant 8 : i32
    %354 = arith.muli %353, %c8_i32_99 : i32
    %355 = tpu.assume_multiple %354, 8 : i32
    %356 = arith.index_cast %355 : i32 to index
    %c0_100 = arith.constant 0 : index
    %357 = vector.load %arg12[%356, %c0_100] : memref<56x192xf32, #tpu.memory_space<vmem>>, vector<8x192xf32>
    %358 = vector.extract_strided_slice %357 {offsets = [0, 96], sizes = [8, 96], strides = [1, 1]} : vector<8x192xf32> to vector<8x96xf32>
    %cst_101 = arith.constant dense<0.000000e+00> : vector<8x96xf32>
    %359 = tpu.matmul %350, %62, %cst_101 {dimension_numbers = #tpu.dot_dimension_numbers<[1], [0], [0], [1], [0, 0, 1, 1], [], []>} : vector<8x32xf32>, vector<32x96xf32>, vector<8x96xf32> -> vector<8x96xf32>
    %360 = vector.broadcast %63 : vector<1x96xf32> to vector<8x96xf32>
    %361 = arith.addf %359, %360 : vector<8x96xf32>
    %362 = vector.extract_strided_slice %358 {offsets = [0, 0], sizes = [8, 32], strides = [1, 1]} : vector<8x96xf32> to vector<8x32xf32>
    %363 = vector.extract_strided_slice %361 {offsets = [0, 0], sizes = [8, 32], strides = [1, 1]} : vector<8x96xf32> to vector<8x32xf32>
    %364 = arith.addf %362, %363 : vector<8x32xf32>
    %365 = arith.negf %364 : vector<8x32xf32>
    %366 = math.exp %365 : vector<8x32xf32>
    %cst_102 = arith.constant 1.000000e+00 : f32
    %367 = vector.broadcast %cst_102 : f32 to vector<8x32xf32>
    %368 = arith.addf %367, %366 : vector<8x32xf32>
    %369 = arith.divf %367, %368 : vector<8x32xf32>
    %370 = vector.extract_strided_slice %358 {offsets = [0, 32], sizes = [8, 32], strides = [1, 1]} : vector<8x96xf32> to vector<8x32xf32>
    %371 = vector.extract_strided_slice %361 {offsets = [0, 32], sizes = [8, 32], strides = [1, 1]} : vector<8x96xf32> to vector<8x32xf32>
    %372 = arith.addf %370, %371 : vector<8x32xf32>
    %373 = arith.negf %372 : vector<8x32xf32>
    %374 = math.exp %373 : vector<8x32xf32>
    %cst_103 = arith.constant 1.000000e+00 : f32
    %375 = vector.broadcast %cst_103 : f32 to vector<8x32xf32>
    %376 = arith.addf %375, %374 : vector<8x32xf32>
    %377 = arith.divf %375, %376 : vector<8x32xf32>
    %378 = vector.extract_strided_slice %358 {offsets = [0, 64], sizes = [8, 32], strides = [1, 1]} : vector<8x96xf32> to vector<8x32xf32>
    %379 = vector.extract_strided_slice %361 {offsets = [0, 64], sizes = [8, 32], strides = [1, 1]} : vector<8x96xf32> to vector<8x32xf32>
    %380 = arith.mulf %369, %379 : vector<8x32xf32>
    %381 = arith.addf %378, %380 : vector<8x32xf32>
    %382 = math.tanh %381 : vector<8x32xf32>
    %cst_104 = arith.constant 1.000000e+00 : f32
    %383 = vector.broadcast %cst_104 : f32 to vector<8x32xf32>
    %384 = arith.subf %383, %377 : vector<8x32xf32>
    %385 = arith.mulf %384, %382 : vector<8x32xf32>
    %386 = arith.mulf %377, %350 : vector<8x32xf32>
    %387 = arith.addf %385, %386 : vector<8x32xf32>
    %388 = arith.index_cast %355 : i32 to index
    %c0_105 = arith.constant 0 : index
    %389 = vector.load %arg14[%388, %c0_105] : memref<56x32xf32, #tpu.memory_space<vmem>>, vector<8x32xf32>
    tpu.vector_store %arg14[%388, %c0_105], %387 {strides = array<i32>} : memref<56x32xf32, #tpu.memory_space<vmem>>, vector<8x32xf32>,
    %c2_i32_106 = arith.constant 2 : i32
    %c6_i32_107 = arith.constant 6 : i32
    %390 = arith.subi %c6_i32_107, %c2_i32_106 : i32
    %c8_i32_108 = arith.constant 8 : i32
    %391 = arith.muli %390, %c8_i32_108 : i32
    %392 = tpu.assume_multiple %391, 8 : i32
    %393 = arith.index_cast %392 : i32 to index
    %c0_109 = arith.constant 0 : index
    %394 = vector.load %arg12[%393, %c0_109] : memref<56x192xf32, #tpu.memory_space<vmem>>, vector<8x192xf32>
    %395 = vector.extract_strided_slice %394 {offsets = [0, 96], sizes = [8, 96], strides = [1, 1]} : vector<8x192xf32> to vector<8x96xf32>
    %cst_110 = arith.constant dense<0.000000e+00> : vector<8x96xf32>
    %396 = tpu.matmul %387, %62, %cst_110 {dimension_numbers = #tpu.dot_dimension_numbers<[1], [0], [0], [1], [0, 0, 1, 1], [], []>} : vector<8x32xf32>, vector<32x96xf32>, vector<8x96xf32> -> vector<8x96xf32>
    %397 = vector.broadcast %63 : vector<1x96xf32> to vector<8x96xf32>
    %398 = arith.addf %396, %397 : vector<8x96xf32>
    %399 = vector.extract_strided_slice %395 {offsets = [0, 0], sizes = [8, 32], strides = [1, 1]} : vector<8x96xf32> to vector<8x32xf32>
    %400 = vector.extract_strided_slice %398 {offsets = [0, 0], sizes = [8, 32], strides = [1, 1]} : vector<8x96xf32> to vector<8x32xf32>
    %401 = arith.addf %399, %400 : vector<8x32xf32>
    %402 = arith.negf %401 : vector<8x32xf32>
    %403 = math.exp %402 : vector<8x32xf32>
    %cst_111 = arith.constant 1.000000e+00 : f32
    %404 = vector.broadcast %cst_111 : f32 to vector<8x32xf32>
    %405 = arith.addf %404, %403 : vector<8x32xf32>
    %406 = arith.divf %404, %405 : vector<8x32xf32>
    %407 = vector.extract_strided_slice %395 {offsets = [0, 32], sizes = [8, 32], strides = [1, 1]} : vector<8x96xf32> to vector<8x32xf32>
    %408 = vector.extract_strided_slice %398 {offsets = [0, 32], sizes = [8, 32], strides = [1, 1]} : vector<8x96xf32> to vector<8x32xf32>
    %409 = arith.addf %407, %408 : vector<8x32xf32>
    %410 = arith.negf %409 : vector<8x32xf32>
    %411 = math.exp %410 : vector<8x32xf32>
    %cst_112 = arith.constant 1.000000e+00 : f32
    %412 = vector.broadcast %cst_112 : f32 to vector<8x32xf32>
    %413 = arith.addf %412, %411 : vector<8x32xf32>
    %414 = arith.divf %412, %413 : vector<8x32xf32>
    %415 = vector.extract_strided_slice %395 {offsets = [0, 64], sizes = [8, 32], strides = [1, 1]} : vector<8x96xf32> to vector<8x32xf32>
    %416 = vector.extract_strided_slice %398 {offsets = [0, 64], sizes = [8, 32], strides = [1, 1]} : vector<8x96xf32> to vector<8x32xf32>
    %417 = arith.mulf %406, %416 : vector<8x32xf32>
    %418 = arith.addf %415, %417 : vector<8x32xf32>
    %419 = math.tanh %418 : vector<8x32xf32>
    %cst_113 = arith.constant 1.000000e+00 : f32
    %420 = vector.broadcast %cst_113 : f32 to vector<8x32xf32>
    %421 = arith.subf %420, %414 : vector<8x32xf32>
    %422 = arith.mulf %421, %419 : vector<8x32xf32>
    %423 = arith.mulf %414, %387 : vector<8x32xf32>
    %424 = arith.addf %422, %423 : vector<8x32xf32>
    %425 = arith.index_cast %392 : i32 to index
    %c0_114 = arith.constant 0 : index
    %426 = vector.load %arg14[%425, %c0_114] : memref<56x32xf32, #tpu.memory_space<vmem>>, vector<8x32xf32>
    tpu.vector_store %arg14[%425, %c0_114], %424 {strides = array<i32>} : memref<56x32xf32, #tpu.memory_space<vmem>>, vector<8x32xf32>,
    %c3_i32_115 = arith.constant 3 : i32
    %c6_i32_116 = arith.constant 6 : i32
    %427 = arith.subi %c6_i32_116, %c3_i32_115 : i32
    %c8_i32_117 = arith.constant 8 : i32
    %428 = arith.muli %427, %c8_i32_117 : i32
    %429 = tpu.assume_multiple %428, 8 : i32
    %430 = arith.index_cast %429 : i32 to index
    %c0_118 = arith.constant 0 : index
    %431 = vector.load %arg12[%430, %c0_118] : memref<56x192xf32, #tpu.memory_space<vmem>>, vector<8x192xf32>
    %432 = vector.extract_strided_slice %431 {offsets = [0, 96], sizes = [8, 96], strides = [1, 1]} : vector<8x192xf32> to vector<8x96xf32>
    %cst_119 = arith.constant dense<0.000000e+00> : vector<8x96xf32>
    %433 = tpu.matmul %424, %62, %cst_119 {dimension_numbers = #tpu.dot_dimension_numbers<[1], [0], [0], [1], [0, 0, 1, 1], [], []>} : vector<8x32xf32>, vector<32x96xf32>, vector<8x96xf32> -> vector<8x96xf32>
    %434 = vector.broadcast %63 : vector<1x96xf32> to vector<8x96xf32>
    %435 = arith.addf %433, %434 : vector<8x96xf32>
    %436 = vector.extract_strided_slice %432 {offsets = [0, 0], sizes = [8, 32], strides = [1, 1]} : vector<8x96xf32> to vector<8x32xf32>
    %437 = vector.extract_strided_slice %435 {offsets = [0, 0], sizes = [8, 32], strides = [1, 1]} : vector<8x96xf32> to vector<8x32xf32>
    %438 = arith.addf %436, %437 : vector<8x32xf32>
    %439 = arith.negf %438 : vector<8x32xf32>
    %440 = math.exp %439 : vector<8x32xf32>
    %cst_120 = arith.constant 1.000000e+00 : f32
    %441 = vector.broadcast %cst_120 : f32 to vector<8x32xf32>
    %442 = arith.addf %441, %440 : vector<8x32xf32>
    %443 = arith.divf %441, %442 : vector<8x32xf32>
    %444 = vector.extract_strided_slice %432 {offsets = [0, 32], sizes = [8, 32], strides = [1, 1]} : vector<8x96xf32> to vector<8x32xf32>
    %445 = vector.extract_strided_slice %435 {offsets = [0, 32], sizes = [8, 32], strides = [1, 1]} : vector<8x96xf32> to vector<8x32xf32>
    %446 = arith.addf %444, %445 : vector<8x32xf32>
    %447 = arith.negf %446 : vector<8x32xf32>
    %448 = math.exp %447 : vector<8x32xf32>
    %cst_121 = arith.constant 1.000000e+00 : f32
    %449 = vector.broadcast %cst_121 : f32 to vector<8x32xf32>
    %450 = arith.addf %449, %448 : vector<8x32xf32>
    %451 = arith.divf %449, %450 : vector<8x32xf32>
    %452 = vector.extract_strided_slice %432 {offsets = [0, 64], sizes = [8, 32], strides = [1, 1]} : vector<8x96xf32> to vector<8x32xf32>
    %453 = vector.extract_strided_slice %435 {offsets = [0, 64], sizes = [8, 32], strides = [1, 1]} : vector<8x96xf32> to vector<8x32xf32>
    %454 = arith.mulf %443, %453 : vector<8x32xf32>
    %455 = arith.addf %452, %454 : vector<8x32xf32>
    %456 = math.tanh %455 : vector<8x32xf32>
    %cst_122 = arith.constant 1.000000e+00 : f32
    %457 = vector.broadcast %cst_122 : f32 to vector<8x32xf32>
    %458 = arith.subf %457, %451 : vector<8x32xf32>
    %459 = arith.mulf %458, %456 : vector<8x32xf32>
    %460 = arith.mulf %451, %424 : vector<8x32xf32>
    %461 = arith.addf %459, %460 : vector<8x32xf32>
    %462 = arith.index_cast %429 : i32 to index
    %c0_123 = arith.constant 0 : index
    %463 = vector.load %arg14[%462, %c0_123] : memref<56x32xf32, #tpu.memory_space<vmem>>, vector<8x32xf32>
    tpu.vector_store %arg14[%462, %c0_123], %461 {strides = array<i32>} : memref<56x32xf32, #tpu.memory_space<vmem>>, vector<8x32xf32>,
    %c4_i32_124 = arith.constant 4 : i32
    %c6_i32_125 = arith.constant 6 : i32
    %464 = arith.subi %c6_i32_125, %c4_i32_124 : i32
    %c8_i32_126 = arith.constant 8 : i32
    %465 = arith.muli %464, %c8_i32_126 : i32
    %466 = tpu.assume_multiple %465, 8 : i32
    %467 = arith.index_cast %466 : i32 to index
    %c0_127 = arith.constant 0 : index
    %468 = vector.load %arg12[%467, %c0_127] : memref<56x192xf32, #tpu.memory_space<vmem>>, vector<8x192xf32>
    %469 = vector.extract_strided_slice %468 {offsets = [0, 96], sizes = [8, 96], strides = [1, 1]} : vector<8x192xf32> to vector<8x96xf32>
    %cst_128 = arith.constant dense<0.000000e+00> : vector<8x96xf32>
    %470 = tpu.matmul %461, %62, %cst_128 {dimension_numbers = #tpu.dot_dimension_numbers<[1], [0], [0], [1], [0, 0, 1, 1], [], []>} : vector<8x32xf32>, vector<32x96xf32>, vector<8x96xf32> -> vector<8x96xf32>
    %471 = vector.broadcast %63 : vector<1x96xf32> to vector<8x96xf32>
    %472 = arith.addf %470, %471 : vector<8x96xf32>
    %473 = vector.extract_strided_slice %469 {offsets = [0, 0], sizes = [8, 32], strides = [1, 1]} : vector<8x96xf32> to vector<8x32xf32>
    %474 = vector.extract_strided_slice %472 {offsets = [0, 0], sizes = [8, 32], strides = [1, 1]} : vector<8x96xf32> to vector<8x32xf32>
    %475 = arith.addf %473, %474 : vector<8x32xf32>
    %476 = arith.negf %475 : vector<8x32xf32>
    %477 = math.exp %476 : vector<8x32xf32>
    %cst_129 = arith.constant 1.000000e+00 : f32
    %478 = vector.broadcast %cst_129 : f32 to vector<8x32xf32>
    %479 = arith.addf %478, %477 : vector<8x32xf32>
    %480 = arith.divf %478, %479 : vector<8x32xf32>
    %481 = vector.extract_strided_slice %469 {offsets = [0, 32], sizes = [8, 32], strides = [1, 1]} : vector<8x96xf32> to vector<8x32xf32>
    %482 = vector.extract_strided_slice %472 {offsets = [0, 32], sizes = [8, 32], strides = [1, 1]} : vector<8x96xf32> to vector<8x32xf32>
    %483 = arith.addf %481, %482 : vector<8x32xf32>
    %484 = arith.negf %483 : vector<8x32xf32>
    %485 = math.exp %484 : vector<8x32xf32>
    %cst_130 = arith.constant 1.000000e+00 : f32
    %486 = vector.broadcast %cst_130 : f32 to vector<8x32xf32>
    %487 = arith.addf %486, %485 : vector<8x32xf32>
    %488 = arith.divf %486, %487 : vector<8x32xf32>
    %489 = vector.extract_strided_slice %469 {offsets = [0, 64], sizes = [8, 32], strides = [1, 1]} : vector<8x96xf32> to vector<8x32xf32>
    %490 = vector.extract_strided_slice %472 {offsets = [0, 64], sizes = [8, 32], strides = [1, 1]} : vector<8x96xf32> to vector<8x32xf32>
    %491 = arith.mulf %480, %490 : vector<8x32xf32>
    %492 = arith.addf %489, %491 : vector<8x32xf32>
    %493 = math.tanh %492 : vector<8x32xf32>
    %cst_131 = arith.constant 1.000000e+00 : f32
    %494 = vector.broadcast %cst_131 : f32 to vector<8x32xf32>
    %495 = arith.subf %494, %488 : vector<8x32xf32>
    %496 = arith.mulf %495, %493 : vector<8x32xf32>
    %497 = arith.mulf %488, %461 : vector<8x32xf32>
    %498 = arith.addf %496, %497 : vector<8x32xf32>
    %499 = arith.index_cast %466 : i32 to index
    %c0_132 = arith.constant 0 : index
    %500 = vector.load %arg14[%499, %c0_132] : memref<56x32xf32, #tpu.memory_space<vmem>>, vector<8x32xf32>
    tpu.vector_store %arg14[%499, %c0_132], %498 {strides = array<i32>} : memref<56x32xf32, #tpu.memory_space<vmem>>, vector<8x32xf32>,
    %c5_i32_133 = arith.constant 5 : i32
    %c6_i32_134 = arith.constant 6 : i32
    %501 = arith.subi %c6_i32_134, %c5_i32_133 : i32
    %c8_i32_135 = arith.constant 8 : i32
    %502 = arith.muli %501, %c8_i32_135 : i32
    %503 = tpu.assume_multiple %502, 8 : i32
    %504 = arith.index_cast %503 : i32 to index
    %c0_136 = arith.constant 0 : index
    %505 = vector.load %arg12[%504, %c0_136] : memref<56x192xf32, #tpu.memory_space<vmem>>, vector<8x192xf32>
    %506 = vector.extract_strided_slice %505 {offsets = [0, 96], sizes = [8, 96], strides = [1, 1]} : vector<8x192xf32> to vector<8x96xf32>
    %cst_137 = arith.constant dense<0.000000e+00> : vector<8x96xf32>
    %507 = tpu.matmul %498, %62, %cst_137 {dimension_numbers = #tpu.dot_dimension_numbers<[1], [0], [0], [1], [0, 0, 1, 1], [], []>} : vector<8x32xf32>, vector<32x96xf32>, vector<8x96xf32> -> vector<8x96xf32>
    %508 = vector.broadcast %63 : vector<1x96xf32> to vector<8x96xf32>
    %509 = arith.addf %507, %508 : vector<8x96xf32>
    %510 = vector.extract_strided_slice %506 {offsets = [0, 0], sizes = [8, 32], strides = [1, 1]} : vector<8x96xf32> to vector<8x32xf32>
    %511 = vector.extract_strided_slice %509 {offsets = [0, 0], sizes = [8, 32], strides = [1, 1]} : vector<8x96xf32> to vector<8x32xf32>
    %512 = arith.addf %510, %511 : vector<8x32xf32>
    %513 = arith.negf %512 : vector<8x32xf32>
    %514 = math.exp %513 : vector<8x32xf32>
    %cst_138 = arith.constant 1.000000e+00 : f32
    %515 = vector.broadcast %cst_138 : f32 to vector<8x32xf32>
    %516 = arith.addf %515, %514 : vector<8x32xf32>
    %517 = arith.divf %515, %516 : vector<8x32xf32>
    %518 = vector.extract_strided_slice %506 {offsets = [0, 32], sizes = [8, 32], strides = [1, 1]} : vector<8x96xf32> to vector<8x32xf32>
    %519 = vector.extract_strided_slice %509 {offsets = [0, 32], sizes = [8, 32], strides = [1, 1]} : vector<8x96xf32> to vector<8x32xf32>
    %520 = arith.addf %518, %519 : vector<8x32xf32>
    %521 = arith.negf %520 : vector<8x32xf32>
    %522 = math.exp %521 : vector<8x32xf32>
    %cst_139 = arith.constant 1.000000e+00 : f32
    %523 = vector.broadcast %cst_139 : f32 to vector<8x32xf32>
    %524 = arith.addf %523, %522 : vector<8x32xf32>
    %525 = arith.divf %523, %524 : vector<8x32xf32>
    %526 = vector.extract_strided_slice %506 {offsets = [0, 64], sizes = [8, 32], strides = [1, 1]} : vector<8x96xf32> to vector<8x32xf32>
    %527 = vector.extract_strided_slice %509 {offsets = [0, 64], sizes = [8, 32], strides = [1, 1]} : vector<8x96xf32> to vector<8x32xf32>
    %528 = arith.mulf %517, %527 : vector<8x32xf32>
    %529 = arith.addf %526, %528 : vector<8x32xf32>
    %530 = math.tanh %529 : vector<8x32xf32>
    %cst_140 = arith.constant 1.000000e+00 : f32
    %531 = vector.broadcast %cst_140 : f32 to vector<8x32xf32>
    %532 = arith.subf %531, %525 : vector<8x32xf32>
    %533 = arith.mulf %532, %530 : vector<8x32xf32>
    %534 = arith.mulf %525, %498 : vector<8x32xf32>
    %535 = arith.addf %533, %534 : vector<8x32xf32>
    %536 = arith.index_cast %503 : i32 to index
    %c0_141 = arith.constant 0 : index
    %537 = vector.load %arg14[%536, %c0_141] : memref<56x32xf32, #tpu.memory_space<vmem>>, vector<8x32xf32>
    tpu.vector_store %arg14[%536, %c0_141], %535 {strides = array<i32>} : memref<56x32xf32, #tpu.memory_space<vmem>>, vector<8x32xf32>,
    %c6_i32_142 = arith.constant 6 : i32
    %c6_i32_143 = arith.constant 6 : i32
    %538 = arith.subi %c6_i32_143, %c6_i32_142 : i32
    %c8_i32_144 = arith.constant 8 : i32
    %539 = arith.muli %538, %c8_i32_144 : i32
    %540 = tpu.assume_multiple %539, 8 : i32
    %541 = arith.index_cast %540 : i32 to index
    %c0_145 = arith.constant 0 : index
    %542 = vector.load %arg12[%541, %c0_145] : memref<56x192xf32, #tpu.memory_space<vmem>>, vector<8x192xf32>
    %543 = vector.extract_strided_slice %542 {offsets = [0, 96], sizes = [8, 96], strides = [1, 1]} : vector<8x192xf32> to vector<8x96xf32>
    %cst_146 = arith.constant dense<0.000000e+00> : vector<8x96xf32>
    %544 = tpu.matmul %535, %62, %cst_146 {dimension_numbers = #tpu.dot_dimension_numbers<[1], [0], [0], [1], [0, 0, 1, 1], [], []>} : vector<8x32xf32>, vector<32x96xf32>, vector<8x96xf32> -> vector<8x96xf32>
    %545 = vector.broadcast %63 : vector<1x96xf32> to vector<8x96xf32>
    %546 = arith.addf %544, %545 : vector<8x96xf32>
    %547 = vector.extract_strided_slice %543 {offsets = [0, 0], sizes = [8, 32], strides = [1, 1]} : vector<8x96xf32> to vector<8x32xf32>
    %548 = vector.extract_strided_slice %546 {offsets = [0, 0], sizes = [8, 32], strides = [1, 1]} : vector<8x96xf32> to vector<8x32xf32>
    %549 = arith.addf %547, %548 : vector<8x32xf32>
    %550 = arith.negf %549 : vector<8x32xf32>
    %551 = math.exp %550 : vector<8x32xf32>
    %cst_147 = arith.constant 1.000000e+00 : f32
    %552 = vector.broadcast %cst_147 : f32 to vector<8x32xf32>
    %553 = arith.addf %552, %551 : vector<8x32xf32>
    %554 = arith.divf %552, %553 : vector<8x32xf32>
    %555 = vector.extract_strided_slice %543 {offsets = [0, 32], sizes = [8, 32], strides = [1, 1]} : vector<8x96xf32> to vector<8x32xf32>
    %556 = vector.extract_strided_slice %546 {offsets = [0, 32], sizes = [8, 32], strides = [1, 1]} : vector<8x96xf32> to vector<8x32xf32>
    %557 = arith.addf %555, %556 : vector<8x32xf32>
    %558 = arith.negf %557 : vector<8x32xf32>
    %559 = math.exp %558 : vector<8x32xf32>
    %cst_148 = arith.constant 1.000000e+00 : f32
    %560 = vector.broadcast %cst_148 : f32 to vector<8x32xf32>
    %561 = arith.addf %560, %559 : vector<8x32xf32>
    %562 = arith.divf %560, %561 : vector<8x32xf32>
    %563 = vector.extract_strided_slice %543 {offsets = [0, 64], sizes = [8, 32], strides = [1, 1]} : vector<8x96xf32> to vector<8x32xf32>
    %564 = vector.extract_strided_slice %546 {offsets = [0, 64], sizes = [8, 32], strides = [1, 1]} : vector<8x96xf32> to vector<8x32xf32>
    %565 = arith.mulf %554, %564 : vector<8x32xf32>
    %566 = arith.addf %563, %565 : vector<8x32xf32>
    %567 = math.tanh %566 : vector<8x32xf32>
    %cst_149 = arith.constant 1.000000e+00 : f32
    %568 = vector.broadcast %cst_149 : f32 to vector<8x32xf32>
    %569 = arith.subf %568, %562 : vector<8x32xf32>
    %570 = arith.mulf %569, %567 : vector<8x32xf32>
    %571 = arith.mulf %562, %535 : vector<8x32xf32>
    %572 = arith.addf %570, %571 : vector<8x32xf32>
    %573 = arith.index_cast %540 : i32 to index
    %c0_150 = arith.constant 0 : index
    %574 = vector.load %arg14[%573, %c0_150] : memref<56x32xf32, #tpu.memory_space<vmem>>, vector<8x32xf32>
    tpu.vector_store %arg14[%573, %c0_150], %572 {strides = array<i32>} : memref<56x32xf32, #tpu.memory_space<vmem>>, vector<8x32xf32>,
    %c7_i32_151 = arith.constant 7 : i32
    %c0_152 = arith.constant 0 : index
    %c0_153 = arith.constant 0 : index
    %575 = vector.load %arg2[%c0_152, %c0_153] : memref<16x1xi32, #tpu.memory_space<vmem>>, vector<16x1xi32>
    %576 = tpu.iota {dimensions = array<i32: 1>} : vector<16x56xi32>
    %577 = vector.broadcast %575 : vector<16x1xi32> to vector<16x56xi32>
    %578 = arith.cmpi eq, %577, %576 : vector<16x56xi32>
    %579 = arith.extui %578 : vector<16x56xi1> to vector<16x56xi32>
    %580 = arith.sitofp %579 : vector<16x56xi32> to vector<16x56xf32>
    %c0_154 = arith.constant 0 : index
    %c0_155 = arith.constant 0 : index
    %581 = vector.load %arg13[%c0_154, %c0_155] : memref<56x32xf32, #tpu.memory_space<vmem>>, vector<56x32xf32>
    %c0_156 = arith.constant 0 : index
    %c0_157 = arith.constant 0 : index
    %582 = vector.load %arg14[%c0_156, %c0_157] : memref<56x32xf32, #tpu.memory_space<vmem>>, vector<56x32xf32>
    %583 = tpu.concatenate %581, %582 in 1 : vector<56x32xf32>, vector<56x32xf32> -> vector<56x64xf32>
    %cst_158 = arith.constant dense<0.000000e+00> : vector<16x64xf32>
    %584 = tpu.matmul %580, %583, %cst_158 {dimension_numbers = #tpu.dot_dimension_numbers<[1], [0], [0], [1], [0, 0, 1, 1], [], []>} : vector<16x56xf32>, vector<56x64xf32>, vector<16x64xf32> -> vector<16x64xf32>
    %c0_159 = arith.constant 0 : index
    %c0_160 = arith.constant 0 : index
    %585 = vector.load %arg11[%c0_159, %c0_160] : memref<16x64xf32, #tpu.memory_space<vmem>>, vector<16x64xf32>
    tpu.vector_store %arg11[%c0_159, %c0_160], %584 {strides = array<i32>} : memref<16x64xf32, #tpu.memory_space<vmem>>, vector<16x64xf32>,
    return
  }
}

</mosaic_0001>

<bundles_post_ra>
// kernel: cmpnn_gru_pallas.1
= control target key start
LH: loop header
LB: loop body
LE: loop exit
PB: predicated region body
PF: predicated region fallthrough
CT: control target
= control target key end

     0   :  { %v1846_v3 = vmov 0   ;;  %s2344_s0 = inlined_call_operand.vmem [shape: f32[16,32], index: 0, kind: input, shape index: {}]   ;;  %s2345_s1 = inlined_call_operand.vmem [shape: s32[56,1], index: 1, kind: input, shape index: {}]   ;;  %s2346_s2 = inlined_call_operand.vmem [shape: s32[16,1], index: 2, kind: input, shape index: {}]   ;;  %s2347_s3 = inlined_call_operand.vmem [shape: s32[16,1], index: 3, kind: input, shape index: {}]   ;;  %s2348_s4 = inlined_call_operand.vmem [shape: f32[1,32], index: 4, kind: input, shape index: {}]   ;;  %s2349_s5 = inlined_call_operand.vmem [shape: bf16[32,192], index: 5, kind: input, shape index: {}]   ;;  %s2350_s6 = inlined_call_operand.vmem [shape: f32[1,192], index: 6, kind: input, shape index: {}]   ;;  %s2351_s7 = inlined_call_operand.vmem [shape: f32[32,96], index: 7, kind: input, shape index: {}]   ;;  %s2352_s8 = inlined_call_operand.vmem [shape: f32[1,96], index: 8, kind: input, shape index: {}]   ;;  %s2353_s9 = inlined_call_operand.vmem [shape: f32[32,96], index: 9, kind: input, shape index: {}]   ;;  %s2354_s10 = inlined_call_operand.vmem [shape: f32[1,96], index: 10, kind: input, shape index: {}]   ;;  %s2355_s11 = inlined_call_operand.hbm [shape: f32[16,64], index: 11, kind: output, shape index: {}]  }
   0x1   :  { %v58_v0 = vld [vmem:[%s2347_s3] sm:$0xff]  ;;  %v1611_v1 = vld [vmem:[%s2349_s5 + $0x10] sm:$0xf]  ;;  %v1676_v2 = vld [vmem:[%s2349_s5 + $0x14] sm:$0xf0]  ;;  %1686 = vset.pattern.permute.xlu1 %v1846_v3  ;;  %1685 = vset.pattern.permute.xlu0 %v1846_v3 }
   0x2   :  { %vm84_vm0 = vcmp.eq.s32.totalorder %v58_v0, 1  ;;  %vm60_vm1 = vcmp.eq.s32.totalorder %v58_v0, 0  ;;  %v1612_v4 = vor.u32 %v1676_v2, %v1611_v1  ;;  %v1675_v5 = vld [vmem:[%s2349_s5 + $0x14] sm:$0xf]  ;;  %v1613_v6 = vld [vmem:[%s2349_s5 + $0x18] sm:$0xf0]  ;;  %1687 = vset.pattern.permute.xlu2 %v1846_v3 }
   0x3   :  { %v86_v7 = vsel %vm84_vm0, 1, %v1846_v3  ;;  %v62_v8 = vsel %vm60_vm1, 1, %v1846_v3  ;;  %v1616_v9 = vor.u32 %v1675_v5, %v1613_v6  ;;  %v59_v10 = vld [vmem:[%s2347_s3 + $0x8] sm:$0xff]  ;;  %v1603_v11 = vld [vmem:[%s2349_s5] sm:$0xf]  ;;  %vm107_vm2 = vcmp.eq.s32.totalorder %v58_v0, 2 }
   0x4   :  { %89 = vperm.xlu1 %1686, %v86_v7   ;;  %65 = vperm.xlu0 %1685, %v62_v8   ;;  %v1674_v12 = vld [vmem:[%s2349_s5 + $0x4] sm:$0xf0]  ;;  %v1673_v13 = vld [vmem:[%s2349_s5 + $0x4] sm:$0xf]  ;;  %vm85_vm3 = vcmp.eq.s32.totalorder %v59_v10, 1  ;;  %v109_v16 = vsel %vm107_vm2, 1, %v1846_v3 }
   0x5   :  { %178 = vmatpush.bf16.msra.mxu0 %v1612_v4  ;;  %192 = vmatpush.bf16.msra.mxu1 %v1616_v9  ;;  %v1604_v14 = vor.u32 %v1674_v12, %v1603_v11  ;;  %v1605_v15 = vld [vmem:[%s2349_s5 + $0x8] sm:$0xf0]  ;;  %v1947_v17 = vld [vmem:[%s2344_s0] sm:$0xff]  ;;  %vm61_vm4 = vcmp.eq.s32.totalorder %v59_v10, 0  ;;  %vm108_vm5 = vcmp.eq.s32.totalorder %v59_v10, 2 }
   0x6   :  { %v1608_v18 = vor.u32 %v1673_v13, %v1605_v15  ;;  %112 = vperm.xlu2 %1687, %v109_v16   ;;  %v1952_v19 = vld [vmem:[%s2344_s0 + $0x8] sm:$0xff]  ;;  %v1703_v20 = vld [vmem:[%s2348_s4] ss:$0 sm:$0xff] }
   0x7   :  { %v46_v21 = vadd.f32 %v1703_v20, %v1947_v17  ;;  %v47_v22 = vadd.f32 %v1703_v20, %v1952_v19 }
   0x8   :  { %16 = vsyncpa [#allocation6], 0  ;;  %v87_v23 = vsel %vm85_vm3, 1, %v1846_v3  ;;  %v63_v24 = vsel %vm61_vm4, 1, %v1846_v3  ;;  %v110_v27 = vsel %vm108_vm5, 1, %v1846_v3  ;;  %v201_v34 = vld [vmem:[%s2345_s1 + $0x8] sm:$0xff] }
   0x9   :  { %179 = vmatpush.bf16.msra.mxu0 %v1604_v14  ;;  %193 = vmatpush.bf16.msra.mxu1 %v1608_v18  ;;  %v48_v25 = vadd.f32 3.0, %v46_v21  ;;  %v49_v26 = vadd.f32 3.0, %v47_v22  ;;  %v200_v35 = vld [vmem:[%s2345_s1] sm:$0xff]  ;;  %vm74_vm6 = vcmask 261120   ;;  %v1970_v41 = vld [vmem:[%s2351_s7 + $0x18] sm:$0xff]  ;;  %v1975_v42 = vld [vmem:[%s2351_s7 + $0x10] sm:$0xff] }
   0xa   :  { %v1986_v45 = vld [vmem:[%s2351_s7 + $0x8] sm:$0xff]  ;;  %v1991_v46 = vld [vmem:[%s2351_s7] sm:$0xff]  ;;  %vm130_vm13 = vcmask 1040384   ;;  %vm132_vm14 = vcmask 1041408   ;;  %vm134_vm15 = vcmask 1042432   ;;  %vm136_vm0 = vcmask 1043456  }
   0xb   :  { %v50_v28 = vmax.f32 %v48_v25, 0.0  ;;  %v51_v29 = vmax.f32 %v49_v26, 0.0  ;;  %vm138_vm1 = vcmask 1044480   ;;  %vm140_vm2 = vcmask 1045504   ;;  %s1848_s14 = smov 64   ;;  %s1849_s16 = smov 32  }
   0xc   :  { %92 = vperm.xlu1 %1686, %v87_v23   ;;  %68 = vperm.xlu0 %1685, %v63_v24   ;;  %vm142_vm3 = vcmask 1046528   ;;  %s1583_s17 = sshll.u32 %s2355_s11, 4  ;;  %s1852_s18 = smov 128   ;;  %s1584_s17 = int_to_ptr.hbm [resolvable:$true] %s1583_s17 }
   0xd   :  { %v52_v30 = vmin.f32 %v50_v28, 6.0  ;;  %v53_v31 = vmin.f32 %v51_v29, 6.0  ;;  %379 = vmatpush.msrb.mxu1 %v1970_v41  ;;  %665 = vmatpush.msrb.mxu0 %v1970_v41  ;;  %s1853_s19 = smov 8  }
   0xe   :  { %115 = vperm.xlu2 %1687, %v110_v27  }
   0xf   :  { %v54_v32 = vmul.f32 %v52_v30, %v46_v21  ;;  %v55_v33 = vmul.f32 %v53_v31, %v47_v22  ;;  %380 = vmatpush.msrb.mxu1 %v1975_v42  ;;  %666 = vmatpush.msrb.mxu0 %v1975_v42 }
  0x11   :  { %v56_v36 = vmul.f32 0.16666667, %v54_v32  ;;  %v57_v37 = vmul.f32 0.16666667, %v55_v33  ;;  %381 = vmatpush.msrb.mxu1 %v1986_v45  ;;  %667 = vmatpush.msrb.mxu0 %v1986_v45  ;;  %v1847_v33 = vmov 0.0  }
  0x13   :  { %v144_v38 = vpack.c.bf16 %v57_v37, %v56_v36  ;;  %382 = vmatpush.msrb.mxu1 %v1991_v46  ;;  %668 = vmatpush.msrb.mxu0 %v1991_v46 }
  0x14   :  { %213 = vperm.xlu1 %1686, %v201_v34   ;;  %210 = vperm.xlu0 %1685, %v200_v35  }
  0x15   :  { %1617 = vmatmul.msk.bf16.vlgmr.msra.gmra.mxu0 %vm74_vm6, %v144_v38  ;;  %1618 = vmatmul.msk.bf16.vlgmr.msra.gmra.mxu1 %vm74_vm6, %v144_v38 }
  0x16   :  { %452 = vmatpush.msra.mxu1 %v1970_v41  ;;  %807 = vmatpush.msra.mxu0 %v1970_v41 }
  0x18   :  { %453 = vmatpush.msra.mxu1 %v1975_v42  ;;  %808 = vmatpush.msra.mxu0 %v1975_v42 }
  0x1a   :  { %454 = vmatpush.msra.mxu1 %v1986_v45  ;;  %809 = vmatpush.msra.mxu0 %v1986_v45 }
  0x1c   :  { %455 = vmatpush.msra.mxu1 %v1991_v46  ;;  %810 = vmatpush.msra.mxu0 %v1991_v46 }
  0x60   :  { %v113_v39 = vpop.permute.xlu2 %112 }
  0x61   :  { %vm117_vm7 = vcmp.eq.s32.totalorder %v113_v39, 1  ;;  %v2038_v39 = vld [vmem:[%s2352_s8] ss:$0 sm:$0xff] }
  0x62   :  { %v119_v43 = vsel %vm117_vm7, %v1947_v17, -1e+30  ;;  %vm263_vm7 = vcmask 130048  }
  0x63   :  { %v121_v47 = vsel %vm74_vm6, %v119_v43, -inf }
  0x68   :  { %v116_v40 = vpop.permute.xlu2 %115 }
  0x69   :  { %vm118_vm8 = vcmp.eq.s32.totalorder %v116_v40, 1 }
  0x6a   :  { %v120_v44 = vsel %vm118_vm8, %v1952_v19, -1e+30  ;;  %vm333_vm8 = vcmask 523264  }
  0x6b   :  { %v122_v48 = vsel %vm74_vm6, %v120_v44, -inf  ;;  %v257_v44 = vld [vmem:[%s2350_s6] sm:$0x3]  ;;  %s1850_s6 = smov 96  }
  0x6c   :  { %v123_v51 = vmax.f32 %v121_v47, %v122_v48  ;;  %v2047_v47 = vperm.slane %v257_v44, 0  ;;  %v2049_v48 = vperm.slane %v257_v44, 1 }
  0x6e   :  { %v124_v52 = vrot.slane %v123_v51, 4 }
  0x70   :  { %v125_v57 = vmax.f32 %v123_v51, %v124_v52 }
  0x72   :  { %v126_v2 = vrot.slane %v125_v57, 2 }
  0x74   :  { %v127_v7 = vmax.f32 %v125_v57, %v126_v2 }
  0x76   :  { %v90_v49 = vpop.permute.xlu1 %89  ;;  %v66_v50 = vpop.permute.xlu0 %65  ;;  %v128_v12 = vrot.slane %v127_v7, 1 }
  0x77   :  { %vm94_vm9 = vcmp.eq.s32.totalorder %v90_v49, 1  ;;  %vm70_vm10 = vcmp.eq.s32.totalorder %v66_v50, 1 }
  0x78   :  { %v96_v53 = vsel %vm94_vm9, %v1947_v17, -1e+30  ;;  %v72_v54 = vsel %vm70_vm10, %v1947_v17, -1e+30  ;;  %v129_v17 = vmax.f32 %v127_v7, %v128_v12 }
  0x79   :  { %v98_v60 = vsel %vm74_vm6, %v96_v53, -inf  ;;  %v75_v61 = vsel %vm74_vm6, %v72_v54, -inf }
  0x7e   :  { %v93_v55 = vpop.permute.xlu1 %92  ;;  %v69_v56 = vpop.permute.xlu0 %68 }
  0x7f   :  { %vm95_vm11 = vcmp.eq.s32.totalorder %v93_v55, 1  ;;  %vm71_vm12 = vcmp.eq.s32.totalorder %v69_v56, 1 }
  0x80   :  { %v97_v58 = vsel %vm95_vm11, %v1952_v19, -1e+30  ;;  %v73_v59 = vsel %vm71_vm12, %v1952_v19, -1e+30  ;;  %v207_v19 = vlaneseq }
  0x81   :  { %v99_v62 = vsel %vm74_vm6, %v97_v58, -inf  ;;  %v76_v63 = vsel %vm74_vm6, %v73_v59, -inf }
  0x82   :  { %v100_v0 = vmax.f32 %v98_v60, %v99_v62  ;;  %v77_v1 = vmax.f32 %v75_v61, %v76_v63  ;;  %v2015_v26 = vand.u32 127, %v207_v19  ;;  %v204_v19 = vld [vmem:[%s2345_s1 + $0x20] sm:$0xff] }
  0x84   :  { %v101_v3 = vrot.slane %v100_v0, 4  ;;  %v78_v4 = vrot.slane %v77_v1, 4 }
  0x86   :  { %v102_v5 = vmax.f32 %v100_v0, %v101_v3  ;;  %v79_v6 = vmax.f32 %v77_v1, %v78_v4  ;;  %v214_v28 = vpop.permute.xlu1 %213  ;;  %v211_v29 = vpop.permute.xlu0 %210 }
  0x87   :  { %vm231_vm4 = vcmp.eq.s32.totalorder %v214_v28, %v2015_v26  ;;  %vm230_vm5 = vcmp.eq.s32.totalorder %v211_v29, %v2015_v26 }
  0x88   :  { %v103_v8 = vrot.slane %v102_v5, 2  ;;  %v80_v9 = vrot.slane %v79_v6, 2  ;;  %v1620_v34 = vsel %vm231_vm4, 1.0, %v1847_v33  ;;  %v1619_v35 = vsel %vm230_vm5, 1.0, %v1847_v33 }
  0x89   :  { %v251_v38 = vpack.c.bf16 %v1620_v34, %v1619_v35 }
  0x8a   :  { %v104_v10 = vmax.f32 %v102_v5, %v103_v8  ;;  %v81_v11 = vmax.f32 %v79_v6, %v80_v9 }
  0x8c   :  { %v105_v13 = vrot.slane %v104_v10, 1  ;;  %v82_v14 = vrot.slane %v81_v11, 1 }
  0x8e   :  { %v106_v15 = vmax.f32 %v104_v10, %v105_v13  ;;  %v83_v16 = vmax.f32 %v81_v11, %v82_v14 }
  0x90   :  { %v131_v18 = vsel %vm130_vm13, %v83_v16, %v106_v15 }
  0x91   :  { %v133_v20 = vsel %vm132_vm14, %v131_v18, %v129_v17  ;;  %v202_v18 = vld [vmem:[%s2345_s1 + $0x10] sm:$0xff] }
  0x92   :  { %v135_v21 = vsel %vm134_vm15, %v133_v20, 0.0  ;;  %v181_v22 = vpop.f32.mrf.mxu0  ;;  %v195_v23 = vpop.f32.mrf.mxu1 }
  0x93   :  { %v137_v24 = vsel %vm136_vm0, %v135_v21, 0.0 }
  0x94   :  { %v139_v25 = vsel %vm138_vm1, %v137_v24, 0.0 }
  0x95   :  { %v141_v27 = vsel %vm140_vm2, %v139_v25, 0.0 }
  0x96   :  { %v2017_v30 = vsel %vm142_vm3, %v141_v27, 0.0 }
  0x97   :  { %1634 = vmatmul.msk.f32.vlgmr.msrb.gmra.mxu1 %vm74_vm6, %v2017_v30 }
  0x98   :  { %594 = vmatpush.msrb.mxu1 %v1970_v41 }
  0x9a   :  { %595 = vmatpush.msrb.mxu1 %v1975_v42  ;;  %v183_v31 = vpop.f32.mrf.mxu0  ;;  %v197_v32 = vpop.f32.mrf.mxu1 }
  0x9b   :  { %v255_v36 = vpack.c.bf16 %v183_v31, %v181_v22  ;;  %v256_v37 = vpack.c.bf16 %v197_v32, %v195_v23  ;;  %v203_v23 = vld [vmem:[%s2345_s1 + $0x18] sm:$0xff] }
  0x9c   :  { %596 = vmatpush.msrb.mxu1 %v1986_v45 }
  0x9d   :  { %283 = vmatpush.bf16.msra.mxu2 %v255_v36  ;;  %311 = vmatpush.bf16.msra.mxu3 %v256_v37 }
  0x9e   :  { %597 = vmatpush.msrb.mxu1 %v1991_v46 }
  0xa0   :  { %1626 = vmatmul.msk.bf16.vlgmr.msra.gmra.mxu2 %vm263_vm7, %v251_v38  ;;  %1630 = vmatmul.msk.bf16.vlgmr.msra.gmra.mxu3 %vm263_vm7, %v251_v38 }
  0xa1   :  { %523 = vmatpush.msrb.mxu2 %v1970_v41 }
  0xa3   :  { %524 = vmatpush.msrb.mxu2 %v1975_v42 }
  0xa5   :  { %525 = vmatpush.msrb.mxu2 %v1986_v45 }
  0xa7   :  { %526 = vmatpush.msrb.mxu2 %v1991_v46 }
 0x114   :  { %v384_v40 = vpop.f32.mrf.mxu1 }
 0x115   :  { %v385_v43 = vadd.f32 %v2038_v39, %v384_v40 }
 0x117   :  { %408 = vrot.lane.b32.xlu2 %v385_v43, %s1848_s14 }
 0x11f   :  { %424 = vrot.lane.b32.xlu2 %v2017_v30, %s1849_s16 }
 0x123   :  { %v285_v49 = vpop.f32.mrf.mxu2  ;;  %v313_v50 = vpop.f32.mrf.mxu3 }
 0x124   :  { %v286_v51 = vadd.f32 %v285_v49, %v2047_v47  ;;  %v314_v52 = vadd.f32 %v313_v50, %v2049_v48 }
 0x126   :  { %332 = vst [vmem:[#allocation2] sm:$0xff] %v286_v51  ;;  %v387_v57 = vadd.f32 %v385_v43, %v286_v51 }
 0x127   :  { %334 = vst.msk [vmem:[#allocation2 + $0x8] sm:$0xff] %vm333_vm8, %v314_v52 }
 0x128   :  { %v1635_v58 = vmul.f32 -1.442695, %v387_v57 }
 0x12a   :  { %1706 = vpow2.f32 %v1635_v58 }
 0x12b   :  { %v287_v53 = vpop.f32.mrf.mxu2  ;;  %v315_v54 = vpop.f32.mrf.mxu3 }
 0x12c   :  { %v2055_v55 = vadd.f32 %v287_v53, %v2047_v47  ;;  %v316_v56 = vadd.f32 %v315_v54, %v2049_v48 }
 0x12e   :  { %335 = vst [vmem:[#allocation2 + $0x10] sm:$0xff] %v2055_v55 }
 0x12f   :  { %336 = vst.msk [vmem:[#allocation2 + $0x18] sm:$0xff] %vm333_vm8, %v316_v56 }
 0x130   :  { %v1707_v59 = vpop.eup %1706 }
 0x131   :  { %v391_v60 = vadd.f32 1.0, %v1707_v59 }
 0x133   :  { %1708 = vrcp.f32 %v391_v60  ;;  %v403_v2 = vand.u32 2147483648, %v391_v60  ;;  %vm397_vm10 = vweird.f32 %v391_v60  ;;  %v401_v3 = vand.u32 2147483647, %v391_v60 }
 0x135   :  { %v404_v5 = vor.u32 1.1754944e-38, %v403_v2  ;;  %vm402_vm12 = vcmp.eq.f32.partialorder %v401_v3, 8.507059e+37 }
 0x139   :  { %v1709_v61 = vpop.eup %1708 }
 0x13a   :  { %v393_v62 = vmul.f32 %v1709_v61, %v391_v60  ;;  %vm398_vm9 = vweird.f32 %v1709_v61 }
 0x13b   :  { %vm399_vm11 = vmor %vm397_vm10, %vm398_vm9 }
 0x13c   :  { %v394_v63 = vsub.f32 1.0, %v393_v62 }
 0x13e   :  { %v395_v0 = vmul.f32 %v1709_v61, %v394_v63 }
 0x140   :  { %v396_v1 = vadd.f32 %v1709_v61, %v395_v0 }
 0x142   :  { %v400_v4 = vsel %vm399_vm11, %v1709_v61, %v396_v1  ;;  %v206_v61 = vld [vmem:[%s2345_s1 + $0x30] sm:$0xff] }
 0x143   :  { %v405_v7 = vsel %vm402_vm12, %v404_v5, %v400_v4 }
 0x144   :  { %v418_v13 = vsub.f32 1.0, %v405_v7 }
 0x171   :  { %v409_v6 = vpop.permute.xlu2 %408 }
 0x172   :  { %v411_v8 = vmul.f32 %v409_v6, %v405_v7 }
 0x174   :  { %413 = vrot.lane.b32.xlu0 %v411_v8, %s1848_s14 }
 0x179   :  { %v425_v12 = vpop.permute.xlu2 %424 }
 0x17a   :  { %v427_v15 = vmul.f32 %v425_v12, %v405_v7 }
 0x1e6   :  { %v414_v9 = vpop.permute.xlu0 %413 }
 0x1e7   :  { %v416_v10 = vadd.f32 %v414_v9, %v286_v51 }
 0x1e9   :  { %1710 = vtanh.f32 %v416_v10 }
 0x1ef   :  { %v1711_v11 = vpop.eup %1710 }
 0x1f0   :  { %420 = vrot.lane.b32.xlu1 %v1711_v11, %s1850_s6 }
 0x262   :  { %v421_v14 = vpop.permute.xlu1 %420 }
 0x263   :  { %v423_v16 = vmul.f32 %v421_v14, %v418_v13 }
 0x265   :  { %v2062_v17 = vadd.f32 %v427_v15, %v423_v16 }
 0x267   :  { %430 = vrot.lane.b32.xlu0 %v2062_v17, %s1850_s6 }
 0x26f   :  { %216 = vperm.xlu0 %1685, %v202_v18  }
 0x277   :  { %222 = vperm.xlu0 %1685, %v204_v19  }
 0x2d9   :  { %v431_v20 = vpop.permute.xlu0 %430 }
 0x2da   :  { %433 = vst.msk [vmem:[#allocation3] sm:$0xff] %vm74_vm6, %v431_v20  ;;  %1636 = vmatmul.msk.f32.vlgmr.msra.gmra.mxu1 %vm74_vm6, %v431_v20 }
 0x2db   :  { %736 = vmatpush.msra.mxu1 %v1970_v41  ;;  %v205_v41 = vld [vmem:[%s2345_s1 + $0x28] sm:$0xff] }
 0x2dd   :  { %737 = vmatpush.msra.mxu1 %v1975_v42 }
 0x2df   :  { %738 = vmatpush.msra.mxu1 %v1986_v45 }
 0x2e1   :  { %739 = vmatpush.msra.mxu1 %v1991_v46  ;;  %v217_v43 = vpop.permute.xlu0 %216 }
 0x2e2   :  { %vm232_vm1 = vcmp.eq.s32.totalorder %v217_v43, %v2015_v26 }
 0x2e3   :  { %v1621_v49 = vsel %vm232_vm1, 1.0, %v1847_v33 }
 0x2e9   :  { %v223_v53 = vpop.permute.xlu0 %222 }
 0x2ea   :  { %vm234_vm4 = vcmp.eq.s32.totalorder %v223_v53, %v2015_v26 }
 0x2eb   :  { %v1623_v56 = vsel %vm234_vm4, 1.0, %v1847_v33 }
 0x357   :  { %v457_v21 = vpop.f32.mrf.mxu1 }
 0x358   :  { %v458_v22 = vadd.f32 %v2038_v39, %v457_v21 }
 0x35a   :  { %481 = vrot.lane.b32.xlu1 %v458_v22, %s1848_s14  ;;  %v460_v42 = vadd.f32 %v458_v22, %v2055_v55 }
 0x35c   :  { %v1637_v45 = vmul.f32 -1.442695, %v460_v42 }
 0x35e   :  { %1712 = vpow2.f32 %v1637_v45 }
 0x362   :  { %219 = vperm.xlu1 %1686, %v203_v23  }
 0x364   :  { %v1713_v46 = vpop.eup %1712 }
 0x365   :  { %v464_v24 = vadd.f32 1.0, %v1713_v46 }
 0x367   :  { %1714 = vrcp.f32 %v464_v24  ;;  %v476_v32 = vand.u32 2147483648, %v464_v24  ;;  %vm470_vm14 = vweird.f32 %v464_v24  ;;  %v474_v34 = vand.u32 2147483647, %v464_v24 }
 0x369   :  { %v477_v36 = vor.u32 1.1754944e-38, %v476_v32  ;;  %vm475_vm0 = vcmp.eq.f32.partialorder %v474_v34, 8.507059e+37 }
 0x36a   :  { %225 = vperm.xlu1 %1686, %v205_v41  }
 0x36d   :  { %v1715_v25 = vpop.eup %1714 }
 0x36e   :  { %v466_v27 = vmul.f32 %v1715_v25, %v464_v24  ;;  %vm471_vm13 = vweird.f32 %v1715_v25 }
 0x36f   :  { %vm472_vm15 = vmor %vm470_vm14, %vm471_vm13 }
 0x370   :  { %v467_v28 = vsub.f32 1.0, %v466_v27 }
 0x372   :  { %v468_v29 = vmul.f32 %v1715_v25, %v467_v28 }
 0x374   :  { %v469_v31 = vadd.f32 %v1715_v25, %v468_v29 }
 0x376   :  { %v473_v35 = vsel %vm472_vm15, %v1715_v25, %v469_v31 }
 0x377   :  { %v478_v38 = vsel %vm475_vm0, %v477_v36, %v473_v35 }
 0x378   :  { %v491_v13 = vsub.f32 1.0, %v478_v38  ;;  %v497_v15 = vmul.f32 %v478_v38, %v2062_v17 }
 0x3cc   :  { %v482_v37 = vpop.permute.xlu1 %481 }
 0x3cd   :  { %v484_v40 = vmul.f32 %v482_v37, %v478_v38 }
 0x3cf   :  { %486 = vrot.lane.b32.xlu2 %v484_v40, %s1848_s14 }
 0x3d4   :  { %v220_v44 = vpop.permute.xlu1 %219 }
 0x3d5   :  { %vm233_vm2 = vcmp.eq.s32.totalorder %v220_v44, %v2015_v26 }
 0x3d6   :  { %v1622_v50 = vsel %vm233_vm2, 1.0, %v1847_v33 }
 0x3d7   :  { %v252_v51 = vpack.c.bf16 %v1622_v50, %v1621_v49 }
 0x3d9   :  { %1627 = vmatmul.msk.bf16.gmra.mxu2 %vm263_vm7, %v252_v51  ;;  %1631 = vmatmul.msk.bf16.gmra.mxu3 %vm263_vm7, %v252_v51 }
 0x3dc   :  { %v226_v52 = vpop.permute.xlu1 %225 }
 0x3dd   :  { %vm235_vm3 = vcmp.eq.s32.totalorder %v226_v52, %v2015_v26 }
 0x3de   :  { %v1624_v54 = vsel %vm235_vm3, 1.0, %v1847_v33 }
 0x3df   :  { %v253_v57 = vpack.c.bf16 %v1624_v54, %v1623_v56 }
 0x3e9   :  { %1628 = vmatmul.msk.bf16.gmra.mxu2 %vm263_vm7, %v253_v57  ;;  %1632 = vmatmul.msk.bf16.gmra.mxu3 %vm263_vm7, %v253_v57 }
 0x429   :  { %v487_v58 = vpop.permute.xlu2 %486 }
 0x42a   :  { %v489_v59 = vadd.f32 %v487_v58, %v2055_v55 }
 0x42c   :  { %1716 = vtanh.f32 %v489_v59 }
 0x432   :  { %v1717_v60 = vpop.eup %1716 }
 0x433   :  { %493 = vrot.lane.b32.xlu2 %v1717_v60, %s1850_s6 }
 0x43b   :  { %228 = vperm.xlu2 %1687, %v206_v61  }
 0x45c   :  { %v290_v62 = vpop.f32.mrf.mxu2  ;;  %v318_v63 = vpop.f32.mrf.mxu3 }
 0x45d   :  { %v2106_v0 = vadd.f32 %v290_v62, %v2047_v47  ;;  %v319_v1 = vadd.f32 %v318_v63, %v2049_v48 }
 0x45f   :  { %338 = vst.msk [vmem:[#allocation2 + $0x28] sm:$0xff] %vm333_vm8, %v319_v1 }
 0x464   :  { %v292_v2 = vpop.f32.mrf.mxu2  ;;  %v320_v55 = vpop.f32.mrf.mxu3 }
 0x465   :  { %v2111_v3 = vadd.f32 %v292_v2, %v2047_v47  ;;  %v321_v4 = vadd.f32 %v320_v55, %v2049_v48 }
 0x467   :  { %340 = vst.msk [vmem:[#allocation2 + $0x38] sm:$0xff] %vm333_vm8, %v321_v4 }
 0x46c   :  { %v295_v5 = vpop.f32.mrf.mxu2  ;;  %v323_v6 = vpop.f32.mrf.mxu3 }
 0x46d   :  { %v2116_v7 = vadd.f32 %v295_v5, %v2047_v47  ;;  %v324_v8 = vadd.f32 %v323_v6, %v2049_v48 }
 0x46f   :  { %342 = vst.msk [vmem:[#allocation2 + $0x48] sm:$0xff] %vm333_vm8, %v324_v8 }
 0x474   :  { %v297_v9 = vpop.f32.mrf.mxu2  ;;  %v325_v10 = vpop.f32.mrf.mxu3 }
 0x475   :  { %v2121_v11 = vadd.f32 %v297_v9, %v2047_v47  ;;  %v326_v12 = vadd.f32 %v325_v10, %v2049_v48 }
 0x477   :  { %344 = vst.msk [vmem:[#allocation2 + $0x58] sm:$0xff] %vm333_vm8, %v326_v12 }
 0x48d   :  { %v494_v14 = vpop.permute.xlu2 %493 }
 0x48e   :  { %v496_v16 = vmul.f32 %v494_v14, %v491_v13 }
 0x490   :  { %v498_v18 = vadd.f32 %v497_v15, %v496_v16 }
 0x492   :  { %500 = vrot.lane.b32.xlu0 %v498_v18, %s1850_s6 }
 0x495   :  { %v229_v19 = vpop.permute.xlu2 %228 }
 0x496   :  { %vm236_vm5 = vcmp.eq.s32.totalorder %v229_v19, %v2015_v26 }
 0x497   :  { %v1625_v20 = vsel %vm236_vm5, 1.0, %v1847_v33 }
 0x498   :  { %v254_v21 = vpack.c.bf16 %v1625_v20, %v1625_v20 }
 0x49a   :  { %1629 = vmatmul.msk.bf16.gmra.mxu2 %vm263_vm7, %v254_v21  ;;  %1633 = vmatmul.msk.bf16.gmra.mxu3 %vm263_vm7, %v254_v21 }
 0x504   :  { %v501_v22 = vpop.permute.xlu0 %500 }
 0x505   :  { %504 = vst.msk [vmem:[#allocation3 + $0x8] sm:$0xff] %vm74_vm6, %v501_v22  ;;  %1638 = vmatmul.msk.f32.vlgmr.msrb.gmra.mxu2 %vm74_vm6, %v501_v22 }
 0x51d   :  { %v300_v17 = vpop.f32.mrf.mxu2  ;;  %v328_v23 = vpop.f32.mrf.mxu3 }
 0x51e   :  { %v2134_v41 = vadd.f32 %v300_v17, %v2047_v47  ;;  %v329_v42 = vadd.f32 %v328_v23, %v2049_v48 }
 0x520   :  { %345 = vst [vmem:[#allocation2 + $0x60] sm:$0xff] %v2134_v41 }
 0x521   :  { %346 = vst.msk [vmem:[#allocation2 + $0x68] sm:$0xff] %vm333_vm8, %v329_v42 }
 0x525   :  { %v302_v45 = vpop.f32.mrf.mxu2  ;;  %v330_v46 = vpop.f32.mrf.mxu3 }
 0x588   :  { %v528_v24 = vpop.f32.mrf.mxu2 }
 0x589   :  { %v529_v25 = vadd.f32 %v2038_v39, %v528_v24 }
 0x58b   :  { %552 = vrot.lane.b32.xlu1 %v529_v25, %s1848_s14  ;;  %v531_v27 = vadd.f32 %v529_v25, %v2106_v0 }
 0x58d   :  { %v1639_v28 = vmul.f32 -1.442695, %v531_v27 }
 0x58f   :  { %1718 = vpow2.f32 %v1639_v28 }
 0x595   :  { %v1719_v29 = vpop.eup %1718 }
 0x596   :  { %v535_v47 = vadd.f32 1.0, %v1719_v29 }
 0x598   :  { %1720 = vrcp.f32 %v535_v47  ;;  %v547_v36 = vand.u32 2147483648, %v535_v47  ;;  %vm541_vm9 = vweird.f32 %v535_v47  ;;  %v545_v37 = vand.u32 2147483647, %v535_v47 }
 0x59a   :  { %v548_v40 = vor.u32 1.1754944e-38, %v547_v36  ;;  %vm546_vm11 = vcmp.eq.f32.partialorder %v545_v37, 8.507059e+37 }
 0x59e   :  { %v1721_v31 = vpop.eup %1720 }
 0x59f   :  { %v537_v48 = vmul.f32 %v1721_v31, %v535_v47  ;;  %vm542_vm7 = vweird.f32 %v1721_v31 }
 0x5a0   :  { %vm543_vm10 = vmor %vm541_vm9, %vm542_vm7 }
 0x5a1   :  { %v538_v32 = vsub.f32 1.0, %v537_v48 }
 0x5a3   :  { %v539_v34 = vmul.f32 %v1721_v31, %v538_v32 }
 0x5a5   :  { %v540_v35 = vadd.f32 %v1721_v31, %v539_v34 }
 0x5a7   :  { %v544_v38 = vsel %vm543_vm10, %v1721_v31, %v540_v35 }
 0x5a8   :  { %v549_v44 = vsel %vm546_vm11, %v548_v40, %v544_v38 }
 0x5a9   :  { %v562_v53 = vsub.f32 1.0, %v549_v44  ;;  %v568_v56 = vmul.f32 %v549_v44, %v498_v18 }
 0x5fd   :  { %v553_v43 = vpop.permute.xlu1 %552 }
 0x5fe   :  { %v555_v49 = vmul.f32 %v553_v43, %v549_v44 }
 0x600   :  { %557 = vrot.lane.b32.xlu2 %v555_v49, %s1848_s14 }
 0x65a   :  { %v558_v50 = vpop.permute.xlu2 %557 }
 0x65b   :  { %v560_v51 = vadd.f32 %v558_v50, %v2106_v0 }
 0x65d   :  { %1722 = vtanh.f32 %v560_v51 }
 0x663   :  { %v1723_v52 = vpop.eup %1722 }
 0x664   :  { %564 = vrot.lane.b32.xlu0 %v1723_v52, %s1850_s6 }
 0x6d6   :  { %v565_v54 = vpop.permute.xlu0 %564 }
 0x6d7   :  { %v567_v57 = vmul.f32 %v565_v54, %v562_v53 }
 0x6d9   :  { %v569_v58 = vadd.f32 %v568_v56, %v567_v57 }
 0x6db   :  { %571 = vrot.lane.b32.xlu1 %v569_v58, %s1850_s6 }
 0x74d   :  { %v572_v59 = vpop.permute.xlu1 %571 }
 0x74e   :  { %575 = vst.msk [vmem:[#allocation3 + $0x10] sm:$0xff] %vm74_vm6, %v572_v59  ;;  %1640 = vmatmul.msk.f32.vlgmr.msrb.gmra.mxu1 %vm74_vm6, %v572_v59  ;;  %v2175_v59 = vld [vmem:[%s2353_s9 + $0x10] sm:$0xff] }
 0x7cb   :  { %v599_v60 = vpop.f32.mrf.mxu1 }
 0x7cc   :  { %v600_v61 = vadd.f32 %v2038_v39, %v599_v60  ;;  %v2182_v60 = vld [vmem:[%s2353_s9 + $0x8] sm:$0xff] }
 0x7ce   :  { %623 = vrot.lane.b32.xlu2 %v600_v61, %s1848_s14  ;;  %v602_v62 = vadd.f32 %v600_v61, %v2111_v3  ;;  %v2191_v61 = vld [vmem:[%s2353_s9] sm:$0xff] }
 0x7d0   :  { %v1641_v63 = vmul.f32 -1.442695, %v602_v62 }
 0x7d2   :  { %1724 = vpow2.f32 %v1641_v63 }
 0x7d8   :  { %v1725_v1 = vpop.eup %1724 }
 0x7d9   :  { %v606_v2 = vadd.f32 1.0, %v1725_v1 }
 0x7db   :  { %1726 = vrcp.f32 %v606_v2  ;;  %v618_v9 = vand.u32 2147483648, %v606_v2  ;;  %vm612_vm13 = vweird.f32 %v606_v2  ;;  %v616_v10 = vand.u32 2147483647, %v606_v2 }
 0x7dd   :  { %v619_v13 = vor.u32 1.1754944e-38, %v618_v9  ;;  %vm617_vm15 = vcmp.eq.f32.partialorder %v616_v10, 8.507059e+37 }
 0x7e1   :  { %v1727_v55 = vpop.eup %1726 }
 0x7e2   :  { %v608_v4 = vmul.f32 %v1727_v55, %v606_v2  ;;  %vm613_vm12 = vweird.f32 %v1727_v55  ;;  %v2220_v2 = vld [vmem:[%s2354_s10] ss:$0 sm:$0xff] }
 0x7e3   :  { %vm614_vm14 = vmor %vm612_vm13, %vm613_vm12 }
 0x7e4   :  { %v609_v5 = vsub.f32 1.0, %v608_v4 }
 0x7e6   :  { %v610_v6 = vmul.f32 %v1727_v55, %v609_v5 }
 0x7e8   :  { %v611_v8 = vadd.f32 %v1727_v55, %v610_v6 }
 0x7ea   :  { %v615_v12 = vsel %vm614_vm14, %v1727_v55, %v611_v8 }
 0x7eb   :  { %v620_v15 = vsel %vm617_vm15, %v619_v13, %v615_v12 }
 0x7ec   :  { %v633_v21 = vsub.f32 1.0, %v620_v15  ;;  %v639_v17 = vmul.f32 %v620_v15, %v569_v58  ;;  %v2170_v58 = vld [vmem:[%s2353_s9 + $0x18] sm:$0xff] }
 0x7ed   :  { %877 = vmatpush.msrb.mxu1 %v2170_v58  ;;  %1322 = vmatpush.msra.mxu2 %v2170_v58 }
 0x7ee   :  { %1411 = vmatpush.msrb.mxu3 %v2170_v58 }
 0x7ef   :  { %878 = vmatpush.msrb.mxu1 %v2175_v59  ;;  %1323 = vmatpush.msra.mxu2 %v2175_v59 }
 0x7f0   :  { %1412 = vmatpush.msrb.mxu3 %v2175_v59 }
 0x7f1   :  { %879 = vmatpush.msrb.mxu1 %v2182_v60  ;;  %1324 = vmatpush.msra.mxu2 %v2182_v60 }
 0x7f2   :  { %1413 = vmatpush.msrb.mxu3 %v2182_v60 }
 0x7f3   :  { %880 = vmatpush.msrb.mxu1 %v2191_v61  ;;  %1325 = vmatpush.msra.mxu2 %v2191_v61 }
 0x7f4   :  { %1414 = vmatpush.msrb.mxu3 %v2191_v61 }
 0x828   :  { %v624_v14 = vpop.permute.xlu2 %623 }
 0x829   :  { %v626_v16 = vmul.f32 %v624_v14, %v620_v15 }
 0x82b   :  { %628 = vrot.lane.b32.xlu0 %v626_v16, %s1848_s14 }
 0x89d   :  { %v629_v18 = vpop.permute.xlu0 %628 }
 0x89e   :  { %v631_v19 = vadd.f32 %v629_v18, %v2111_v3 }
 0x8a0   :  { %1728 = vtanh.f32 %v631_v19 }
 0x8a6   :  { %v1729_v20 = vpop.eup %1728 }
 0x8a7   :  { %635 = vrot.lane.b32.xlu1 %v1729_v20, %s1850_s6 }
 0x919   :  { %v636_v22 = vpop.permute.xlu1 %635 }
 0x91a   :  { %v638_v23 = vmul.f32 %v636_v22, %v633_v21 }
 0x91c   :  { %v640_v42 = vadd.f32 %v639_v17, %v638_v23 }
 0x91e   :  { %642 = vrot.lane.b32.xlu2 %v640_v42, %s1850_s6 }
 0x978   :  { %v643_v45 = vpop.permute.xlu2 %642 }
 0x979   :  { %646 = vst.msk [vmem:[#allocation3 + $0x18] sm:$0xff] %vm74_vm6, %v643_v45  ;;  %1642 = vmatmul.msk.f32.vlgmr.msrb.gmra.mxu0 %vm74_vm6, %v643_v45 }
 0x97a   :  { %966 = vmatpush.msrb.mxu0 %v2170_v58 }
 0x97c   :  { %967 = vmatpush.msrb.mxu0 %v2175_v59 }
 0x97e   :  { %968 = vmatpush.msrb.mxu0 %v2182_v60 }
 0x980   :  { %969 = vmatpush.msrb.mxu0 %v2191_v61 }
 0x9f6   :  { %v670_v46 = vpop.f32.mrf.mxu0 }
 0x9f7   :  { %v671_v24 = vadd.f32 %v2038_v39, %v670_v46 }
 0x9f9   :  { %694 = vrot.lane.b32.xlu0 %v671_v24, %s1848_s14  ;;  %v673_v25 = vadd.f32 %v671_v24, %v2116_v7 }
 0x9fb   :  { %v1643_v27 = vmul.f32 -1.442695, %v673_v25 }
 0x9fd   :  { %1730 = vpow2.f32 %v1643_v27 }
 0xa03   :  { %v1731_v28 = vpop.eup %1730 }
 0xa04   :  { %v677_v29 = vadd.f32 1.0, %v1731_v28 }
 0xa06   :  { %1732 = vrcp.f32 %v677_v29  ;;  %v689_v35 = vand.u32 2147483648, %v677_v29  ;;  %vm683_vm1 = vweird.f32 %v677_v29  ;;  %v687_v36 = vand.u32 2147483647, %v677_v29 }
 0xa08   :  { %v690_v38 = vor.u32 1.1754944e-38, %v689_v35  ;;  %vm688_vm3 = vcmp.eq.f32.partialorder %v687_v36, 8.507059e+37  ;;  %v861_v36 = vld [vmem:[#allocation2 + $0x68] sm:$0xff] }
 0xa0c   :  { %v1733_v47 = vpop.eup %1732 }
 0xa0d   :  { %v679_v31 = vmul.f32 %v1733_v47, %v677_v29  ;;  %vm684_vm0 = vweird.f32 %v1733_v47 }
 0xa0e   :  { %vm685_vm2 = vmor %vm683_vm1, %vm684_vm0 }
 0xa0f   :  { %v680_v48 = vsub.f32 1.0, %v679_v31 }
 0xa11   :  { %v681_v32 = vmul.f32 %v1733_v47, %v680_v48 }
 0xa13   :  { %v682_v34 = vadd.f32 %v1733_v47, %v681_v32 }
 0xa15   :  { %v686_v37 = vsel %vm685_vm2, %v1733_v47, %v682_v34 }
 0xa16   :  { %v691_v43 = vsel %vm688_vm3, %v690_v38, %v686_v37 }
 0xa17   :  { %v704_v52 = vsub.f32 1.0, %v691_v43  ;;  %v710_v54 = vmul.f32 %v691_v43, %v640_v42 }
 0xa6b   :  { %v695_v40 = vpop.permute.xlu0 %694 }
 0xa6c   :  { %v697_v44 = vmul.f32 %v695_v40, %v691_v43 }
 0xa6e   :  { %699 = vrot.lane.b32.xlu1 %v697_v44, %s1848_s14 }
 0xae0   :  { %v700_v49 = vpop.permute.xlu1 %699 }
 0xae1   :  { %v702_v50 = vadd.f32 %v700_v49, %v2116_v7 }
 0xae3   :  { %1734 = vtanh.f32 %v702_v50 }
 0xae9   :  { %v1735_v51 = vpop.eup %1734 }
 0xaea   :  { %706 = vrot.lane.b32.xlu2 %v1735_v51, %s1850_s6 }
 0xb44   :  { %v707_v53 = vpop.permute.xlu2 %706 }
 0xb45   :  { %v709_v56 = vmul.f32 %v707_v53, %v704_v52 }
 0xb47   :  { %v2163_v57 = vadd.f32 %v710_v54, %v709_v56 }
 0xb49   :  { %713 = vrot.lane.b32.xlu0 %v2163_v57, %s1850_s6 }
 0xbbb   :  { %v714_v62 = vpop.permute.xlu0 %713 }
 0xbbc   :  { %717 = vst.msk [vmem:[#allocation3 + $0x20] sm:$0xff] %vm74_vm6, %v714_v62  ;;  %1644 = vmatmul.msk.f32.vlgmr.msra.gmra.mxu1 %vm74_vm6, %v714_v62 }
 0xbbd   :  { %1055 = vmatpush.msra.mxu1 %v2170_v58 }
 0xbbf   :  { %1056 = vmatpush.msra.mxu1 %v2175_v59 }
 0xbc1   :  { %1057 = vmatpush.msra.mxu1 %v2182_v60 }
 0xbc3   :  { %1058 = vmatpush.msra.mxu1 %v2191_v61 }
 0xbc4   :  { %1648 = vmatmul.msk.f32.vlgmr.msrb.gmra.mxu1 %vm74_vm6, %v2017_v30 }
 0xbc5   :  { %1233 = vmatpush.msrb.mxu1 %v2170_v58 }
 0xbc7   :  { %1234 = vmatpush.msrb.mxu1 %v2175_v59 }
 0xbc9   :  { %1235 = vmatpush.msrb.mxu1 %v2182_v60 }
 0xbcb   :  { %1236 = vmatpush.msrb.mxu1 %v2191_v61 }
 0xc39   :  { %v741_v63 = vpop.f32.mrf.mxu1 }
 0xc3a   :  { %v742_v1 = vadd.f32 %v2038_v39, %v741_v63 }
 0xc3c   :  { %765 = vrot.lane.b32.xlu1 %v742_v1, %s1848_s14  ;;  %v744_v5 = vadd.f32 %v742_v1, %v2121_v11 }
 0xc3e   :  { %v1645_v6 = vmul.f32 -1.442695, %v744_v5 }
 0xc40   :  { %1736 = vpow2.f32 %v1645_v6 }
 0xc41   :  { %v882_v55 = vpop.f32.mrf.mxu1 }
 0xc42   :  { %v883_v4 = vadd.f32 %v2220_v2, %v882_v55 }
 0xc44   :  { %886 = vrot.lane.b32.xlu2 %v883_v4, %s1850_s6  ;;  %929 = vrot.lane.b32.xlu1 %v883_v4, %s1849_s16 }
 0xc46   :  { %v1737_v8 = vpop.eup %1736 }
 0xc47   :  { %v748_v39 = vadd.f32 1.0, %v1737_v8 }
 0xc49   :  { %1738 = vrcp.f32 %v748_v39  ;;  %v760_v19 = vand.u32 2147483648, %v748_v39  ;;  %vm754_vm5 = vweird.f32 %v748_v39  ;;  %v758_v21 = vand.u32 2147483647, %v748_v39 }
 0xc4b   :  { %v761_v23 = vor.u32 1.1754944e-38, %v760_v19  ;;  %vm759_vm9 = vcmp.eq.f32.partialorder %v758_v21, 8.507059e+37 }
 0xc4f   :  { %v1739_v9 = vpop.eup %1738 }
 0xc50   :  { %v750_v10 = vmul.f32 %v1739_v9, %v748_v39  ;;  %vm755_vm4 = vweird.f32 %v1739_v9 }
 0xc51   :  { %vm756_vm7 = vmor %vm754_vm5, %vm755_vm4 }
 0xc52   :  { %v751_v14 = vsub.f32 1.0, %v750_v10 }
 0xc54   :  { %v752_v16 = vmul.f32 %v1739_v9, %v751_v14 }
 0xc56   :  { %v753_v18 = vadd.f32 %v1739_v9, %v752_v16 }
 0xc58   :  { %v757_v17 = vsel %vm756_vm7, %v1739_v9, %v753_v18 }
 0xc59   :  { %v762_v45 = vsel %vm759_vm9, %v761_v23, %v757_v17 }
 0xc5a   :  { %v775_v14 = vsub.f32 1.0, %v762_v45  ;;  %v781_v16 = vmul.f32 %v762_v45, %v2163_v57 }
 0xc9e   :  { %v887_v12 = vpop.permute.xlu2 %886 }
 0xc9f   :  { %v889_v13 = vadd.f32 %v887_v12, %v2134_v41  ;;  %v909_v50 = vadd.f32 %v887_v12, %v861_v36 }
 0xca1   :  { %v1649_v15 = vmul.f32 -1.442695, %v889_v13  ;;  %v1650_v51 = vmul.f32 -1.442695, %v909_v50 }
 0xca3   :  { %1740 = vpow2.f32 %v1649_v15 }
 0xca9   :  { %v1741_v20 = vpop.eup %1740 }
 0xcaa   :  { %v893_v22 = vadd.f32 1.0, %v1741_v20 }
 0xcac   :  { %1742 = vrcp.f32 %v893_v22  ;;  %v905_v27 = vand.u32 2147483648, %v893_v22  ;;  %v903_v29 = vand.u32 2147483647, %v893_v22  ;;  %vm899_vm11 = vweird.f32 %v893_v22 }
 0xcae   :  { %v766_v42 = vpop.permute.xlu1 %765  ;;  %v906_v31 = vor.u32 1.1754944e-38, %v905_v27  ;;  %vm904_vm13 = vcmp.eq.f32.partialorder %v903_v29, 8.507059e+37 }
 0xcaf   :  { %v768_v46 = vmul.f32 %v766_v42, %v762_v45 }
 0xcb1   :  { %770 = vrot.lane.b32.xlu0 %v768_v46, %s1848_s14 }
 0xcb2   :  { %v1743_v41 = vpop.eup %1742 }
 0xcb3   :  { %v895_v24 = vmul.f32 %v1743_v41, %v893_v22  ;;  %vm900_vm10 = vweird.f32 %v1743_v41 }
 0xcb4   :  { %vm901_vm12 = vmor %vm899_vm11, %vm900_vm10 }
 0xcb5   :  { %v896_v25 = vsub.f32 1.0, %v895_v24 }
 0xcb6   :  { %v930_v34 = vpop.permute.xlu1 %929 }
 0xcb7   :  { %v897_v28 = vmul.f32 %v1743_v41, %v896_v25 }
 0xcb9   :  { %v898_v47 = vadd.f32 %v1743_v41, %v897_v28 }
 0xcbb   :  { %v902_v48 = vsel %vm901_vm12, %v1743_v41, %v898_v47  ;;  %v950_v47 = vld [vmem:[#allocation2 + $0x58] sm:$0xff] }
 0xcbc   :  { %v907_v32 = vsel %vm904_vm13, %v906_v31, %v902_v48 }
 0xcbd   :  { %v932_v35 = vmul.f32 %v930_v34, %v907_v32 }
 0xcbf   :  { %934 = vrot.lane.b32.xlu2 %v932_v35, %s1848_s14 }
 0xd19   :  { %v935_v37 = vpop.permute.xlu2 %934 }
 0xd1a   :  { %v937_v38 = vadd.f32 %v935_v37, %v861_v36 }
 0xd1c   :  { %1744 = vtanh.f32 %v937_v38 }
 0xd22   :  { %v1745_v40 = vpop.eup %1744 }
 0xd23   :  { %941 = vrot.lane.b32.xlu2 %v1745_v40, %s1850_s6  ;;  %v771_v43 = vpop.permute.xlu0 %770 }
 0xd24   :  { %v773_v44 = vadd.f32 %v771_v43, %v2121_v11 }
 0xd26   :  { %1746 = vtanh.f32 %v773_v44 }
 0xd27   :  { %1748 = vpow2.f32 %v1650_v51 }
 0xd2c   :  { %v1747_v49 = vpop.eup %1746 }
 0xd2d   :  { %777 = vrot.lane.b32.xlu0 %v1747_v49, %s1850_s6  ;;  %v1749_v52 = vpop.eup %1748 }
 0xd2e   :  { %v913_v53 = vadd.f32 1.0, %v1749_v52 }
 0xd30   :  { %1750 = vrcp.f32 %v913_v53  ;;  %v925_v55 = vand.u32 2147483648, %v913_v53  ;;  %vm919_vm15 = vweird.f32 %v913_v53  ;;  %v923_v4 = vand.u32 2147483647, %v913_v53 }
 0xd32   :  { %v926_v6 = vor.u32 1.1754944e-38, %v925_v55  ;;  %vm924_vm1 = vcmp.eq.f32.partialorder %v923_v4, 8.507059e+37 }
 0xd36   :  { %v1751_v54 = vpop.eup %1750 }
 0xd37   :  { %v915_v56 = vmul.f32 %v1751_v54, %v913_v53  ;;  %vm920_vm14 = vweird.f32 %v1751_v54 }
 0xd38   :  { %vm921_vm0 = vmor %vm919_vm15, %vm920_vm14 }
 0xd39   :  { %v916_v62 = vsub.f32 1.0, %v915_v56 }
 0xd3b   :  { %v917_v63 = vmul.f32 %v1751_v54, %v916_v62 }
 0xd3d   :  { %v918_v1 = vadd.f32 %v1751_v54, %v917_v63 }
 0xd3f   :  { %v922_v5 = vsel %vm921_vm0, %v1751_v54, %v918_v1 }
 0xd40   :  { %v927_v8 = vsel %vm924_vm1, %v926_v6, %v922_v5 }
 0xd41   :  { %v939_v39 = vsub.f32 1.0, %v927_v8  ;;  %v945_v10 = vmul.f32 %v927_v8, %v2017_v30 }
 0xd7d   :  { %v942_v9 = vpop.permute.xlu2 %941 }
 0xd7e   :  { %v944_v12 = vmul.f32 %v942_v9, %v939_v39 }
 0xd80   :  { %v2233_v13 = vadd.f32 %v945_v10, %v944_v12 }
 0xd82   :  { %948 = vst.msk [vmem:[#allocation4 + $0x30] sm:$0xff] %vm74_vm6, %v2233_v13 }
 0xd9f   :  { %v778_v15 = vpop.permute.xlu0 %777 }
 0xda0   :  { %v780_v18 = vmul.f32 %v778_v15, %v775_v14 }
 0xda2   :  { %v2238_v19 = vadd.f32 %v781_v16, %v780_v18 }
 0xda4   :  { %784 = vrot.lane.b32.xlu1 %v2238_v19, %s1850_s6 }
 0xe16   :  { %v785_v20 = vpop.permute.xlu1 %784 }
 0xe17   :  { %788 = vst.msk [vmem:[#allocation3 + $0x28] sm:$0xff] %vm74_vm6, %v785_v20  ;;  %1646 = vmatmul.msk.f32.vlgmr.msra.gmra.mxu0 %vm74_vm6, %v785_v20 }
 0xe18   :  { %1144 = vmatpush.msra.mxu0 %v2170_v58 }
 0xe1a   :  { %1145 = vmatpush.msra.mxu0 %v2175_v59 }
 0xe1c   :  { %1146 = vmatpush.msra.mxu0 %v2182_v60 }
 0xe1e   :  { %1147 = vmatpush.msra.mxu0 %v2191_v61 }
 0xe1f   :  { %1651 = vmatmul.msk.f32.vlgmr.msrb.gmra.mxu0 %vm74_vm6, %v2233_v13 }
 0xe94   :  { %v2250_v30 = vpop.f32.mrf.mxu0 }
 0xe9c   :  { %v971_v57 = vpop.f32.mrf.mxu0 }
 0xe9d   :  { %v972_v21 = vadd.f32 %v2220_v2, %v971_v57 }
 0xe9f   :  { %1018 = vrot.lane.b32.xlu1 %v972_v21, %s1849_s16  ;;  %975 = vrot.lane.b32.xlu0 %v972_v21, %s1850_s6 }
 0xf11   :  { %v976_v22 = vpop.permute.xlu0 %975  ;;  %v1019_v28 = vpop.permute.xlu1 %1018 }
 0xf12   :  { %v978_v58 = vadd.f32 %v976_v22, %v2121_v11  ;;  %v998_v34 = vadd.f32 %v976_v22, %v950_v47 }
 0xf14   :  { %v1652_v59 = vmul.f32 -1.442695, %v978_v58  ;;  %v1653_v35 = vmul.f32 -1.442695, %v998_v34 }
 0xf16   :  { %1752 = vpow2.f32 %v1652_v59  ;;  %v1039_v59 = vld [vmem:[#allocation2 + $0x48] sm:$0xff] }
 0xf1c   :  { %v1753_v60 = vpop.eup %1752 }
 0xf1d   :  { %v982_v17 = vadd.f32 1.0, %v1753_v60 }
 0xf1f   :  { %1754 = vrcp.f32 %v982_v17  ;;  %v994_v45 = vand.u32 2147483648, %v982_v17  ;;  %v992_v41 = vand.u32 2147483647, %v982_v17  ;;  %vm988_vm3 = vweird.f32 %v982_v17 }
 0xf21   :  { %v995_v25 = vor.u32 1.1754944e-38, %v994_v45  ;;  %vm993_vm5 = vcmp.eq.f32.partialorder %v992_v41, 8.507059e+37 }
 0xf25   :  { %v1755_v61 = vpop.eup %1754 }
 0xf26   :  { %v984_v23 = vmul.f32 %v1755_v61, %v982_v17  ;;  %vm989_vm2 = vweird.f32 %v1755_v61 }
 0xf27   :  { %vm990_vm4 = vmor %vm988_vm3, %vm989_vm2 }
 0xf28   :  { %v985_v42 = vsub.f32 1.0, %v984_v23 }
 0xf2a   :  { %v986_v46 = vmul.f32 %v1755_v61, %v985_v42 }
 0xf2c   :  { %v987_v24 = vadd.f32 %v1755_v61, %v986_v46 }
 0xf2e   :  { %v991_v27 = vsel %vm990_vm4, %v1755_v61, %v987_v24 }
 0xf2f   :  { %v996_v11 = vsel %vm993_vm5, %v995_v25, %v991_v27 }
 0xf30   :  { %v1021_v29 = vmul.f32 %v1019_v28, %v996_v11 }
 0xf32   :  { %1023 = vrot.lane.b32.xlu2 %v1021_v29, %s1848_s14 }
 0xf8c   :  { %v1024_v31 = vpop.permute.xlu2 %1023 }
 0xf8d   :  { %v1026_v48 = vadd.f32 %v1024_v31, %v950_v47 }
 0xf8f   :  { %1756 = vtanh.f32 %v1026_v48 }
 0xf90   :  { %1758 = vpow2.f32 %v1653_v35 }
 0xf95   :  { %v1757_v32 = vpop.eup %1756 }
 0xf96   :  { %1030 = vrot.lane.b32.xlu0 %v1757_v32, %s1850_s6  ;;  %v1759_v36 = vpop.eup %1758 }
 0xf97   :  { %v1002_v37 = vadd.f32 1.0, %v1759_v36 }
 0xf99   :  { %1760 = vrcp.f32 %v1002_v37  ;;  %v1014_v50 = vand.u32 2147483648, %v1002_v37  ;;  %vm1008_vm9 = vweird.f32 %v1002_v37  ;;  %v1012_v51 = vand.u32 2147483647, %v1002_v37 }
 0xf9b   :  { %v1015_v53 = vor.u32 1.1754944e-38, %v1014_v50  ;;  %vm1013_vm11 = vcmp.eq.f32.partialorder %v1012_v51, 8.507059e+37 }
 0xf9f   :  { %v1761_v38 = vpop.eup %1760 }
 0xfa0   :  { %v1004_v40 = vmul.f32 %v1761_v38, %v1002_v37  ;;  %vm1009_vm7 = vweird.f32 %v1761_v38 }
 0xfa1   :  { %vm1010_vm10 = vmor %vm1008_vm9, %vm1009_vm7 }
 0xfa2   :  { %v1005_v43 = vsub.f32 1.0, %v1004_v40 }
 0xfa4   :  { %v1006_v44 = vmul.f32 %v1761_v38, %v1005_v43 }
 0xfa6   :  { %v1007_v49 = vadd.f32 %v1761_v38, %v1006_v44 }
 0xfa8   :  { %v1011_v52 = vsel %vm1010_vm10, %v1761_v38, %v1007_v49 }
 0xfa9   :  { %v1016_v54 = vsel %vm1013_vm11, %v1015_v53, %v1011_v52 }
 0xfaa   :  { %v1028_v56 = vsub.f32 1.0, %v1016_v54  ;;  %v1034_v63 = vmul.f32 %v1016_v54, %v2233_v13 }
0x1008   :  { %v1031_v62 = vpop.permute.xlu0 %1030 }
0x1009   :  { %v1033_v1 = vmul.f32 %v1031_v62, %v1028_v56 }
0x100b   :  { %v1035_v55 = vadd.f32 %v1034_v63, %v1033_v1 }
0x100d   :  { %1037 = vst.msk [vmem:[#allocation4 + $0x28] sm:$0xff] %vm74_vm6, %v1035_v55  ;;  %1654 = vmatmul.msk.f32.vlgmr.msra.gmra.mxu1 %vm74_vm6, %v1035_v55 }
0x108a   :  { %v1060_v4 = vpop.f32.mrf.mxu1 }
0x108b   :  { %v1061_v5 = vadd.f32 %v2220_v2, %v1060_v4 }
0x108d   :  { %1107 = vrot.lane.b32.xlu2 %v1061_v5, %s1849_s16  ;;  %1064 = vrot.lane.b32.xlu1 %v1061_v5, %s1850_s6 }
0x10e7   :  { %v1108_v22 = vpop.permute.xlu2 %1107 }
0x10ff   :  { %v1065_v6 = vpop.permute.xlu1 %1064 }
0x1100   :  { %v1067_v8 = vadd.f32 %v1065_v6, %v2116_v7  ;;  %v1087_v23 = vadd.f32 %v1065_v6, %v1039_v59 }
0x1102   :  { %v1655_v39 = vmul.f32 -1.442695, %v1067_v8  ;;  %v1656_v42 = vmul.f32 -1.442695, %v1087_v23  ;;  %v1128_v8 = vld [vmem:[#allocation2 + $0x38] sm:$0xff] }
0x1104   :  { %1762 = vpow2.f32 %v1655_v39 }
0x110a   :  { %v1763_v9 = vpop.eup %1762 }
0x110b   :  { %v1071_v10 = vadd.f32 1.0, %v1763_v9 }
0x110d   :  { %1764 = vrcp.f32 %v1071_v10  ;;  %v1083_v15 = vand.u32 2147483648, %v1071_v10  ;;  %v1081_v18 = vand.u32 2147483647, %v1071_v10  ;;  %vm1077_vm13 = vweird.f32 %v1071_v10 }
0x110f   :  { %v1084_v57 = vor.u32 1.1754944e-38, %v1083_v15  ;;  %vm1082_vm15 = vcmp.eq.f32.partialorder %v1081_v18, 8.507059e+37 }
0x1113   :  { %v1765_v12 = vpop.eup %1764 }
0x1114   :  { %v1073_v13 = vmul.f32 %v1765_v12, %v1071_v10  ;;  %vm1078_vm12 = vweird.f32 %v1765_v12 }
0x1115   :  { %vm1079_vm14 = vmor %vm1077_vm13, %vm1078_vm12 }
0x1116   :  { %v1074_v14 = vsub.f32 1.0, %v1073_v13 }
0x1118   :  { %v1075_v16 = vmul.f32 %v1765_v12, %v1074_v14 }
0x111a   :  { %v1076_v20 = vadd.f32 %v1765_v12, %v1075_v16 }
0x111c   :  { %v1080_v21 = vsel %vm1079_vm14, %v1765_v12, %v1076_v20 }
0x111d   :  { %v1085_v7 = vsel %vm1082_vm15, %v1084_v57, %v1080_v21 }
0x111e   :  { %v1110_v58 = vmul.f32 %v1108_v22, %v1085_v7 }
0x1120   :  { %1112 = vrot.lane.b32.xlu0 %v1110_v58, %s1848_s14 }
0x1192   :  { %v1113_v60 = vpop.permute.xlu0 %1112 }
0x1193   :  { %v1115_v17 = vadd.f32 %v1113_v60, %v1039_v59 }
0x1195   :  { %1766 = vtanh.f32 %v1115_v17 }
0x1196   :  { %1768 = vpow2.f32 %v1656_v42 }
0x119b   :  { %v1767_v61 = vpop.eup %1766 }
0x119c   :  { %1119 = vrot.lane.b32.xlu1 %v1767_v61, %s1850_s6  ;;  %v1769_v45 = vpop.eup %1768 }
0x119d   :  { %v1091_v46 = vadd.f32 1.0, %v1769_v45 }
0x119f   :  { %1770 = vrcp.f32 %v1091_v46  ;;  %v1103_v11 = vand.u32 2147483648, %v1091_v46  ;;  %vm1097_vm1 = vweird.f32 %v1091_v46  ;;  %v1101_v29 = vand.u32 2147483647, %v1091_v46 }
0x11a1   :  { %v1104_v31 = vor.u32 1.1754944e-38, %v1103_v11  ;;  %vm1102_vm3 = vcmp.eq.f32.partialorder %v1101_v29, 8.507059e+37 }
0x11a5   :  { %v1771_v41 = vpop.eup %1770 }
0x11a6   :  { %v1093_v24 = vmul.f32 %v1771_v41, %v1091_v46  ;;  %vm1098_vm0 = vweird.f32 %v1771_v41 }
0x11a7   :  { %vm1099_vm2 = vmor %vm1097_vm1, %vm1098_vm0 }
0x11a8   :  { %v1094_v25 = vsub.f32 1.0, %v1093_v24 }
0x11aa   :  { %v1095_v27 = vmul.f32 %v1771_v41, %v1094_v25 }
0x11ac   :  { %v1096_v28 = vadd.f32 %v1771_v41, %v1095_v27 }
0x11ae   :  { %v1100_v47 = vsel %vm1099_vm2, %v1771_v41, %v1096_v28 }
0x11af   :  { %v1105_v48 = vsel %vm1102_vm3, %v1104_v31, %v1100_v47 }
0x11b0   :  { %v1117_v32 = vsub.f32 1.0, %v1105_v48  ;;  %v1123_v35 = vmul.f32 %v1105_v48, %v1035_v55 }
0x120e   :  { %v1120_v34 = vpop.permute.xlu1 %1119 }
0x120f   :  { %v1122_v36 = vmul.f32 %v1120_v34, %v1117_v32 }
0x1211   :  { %v1124_v37 = vadd.f32 %v1123_v35, %v1122_v36 }
0x1213   :  { %1126 = vst.msk [vmem:[#allocation4 + $0x20] sm:$0xff] %vm74_vm6, %v1124_v37  ;;  %1657 = vmatmul.msk.f32.vlgmr.msra.gmra.mxu0 %vm74_vm6, %v1124_v37 }
0x1290   :  { %v1149_v38 = vpop.f32.mrf.mxu0 }
0x1291   :  { %v1150_v40 = vadd.f32 %v2220_v2, %v1149_v38 }
0x1293   :  { %1196 = vrot.lane.b32.xlu0 %v1150_v40, %s1849_s16  ;;  %1153 = vrot.lane.b32.xlu2 %v1150_v40, %s1850_s6 }
0x12ed   :  { %v1154_v43 = vpop.permute.xlu2 %1153 }
0x12ee   :  { %v1156_v44 = vadd.f32 %v1154_v43, %v2111_v3  ;;  %v1176_v12 = vadd.f32 %v1154_v43, %v1128_v8  ;;  %v1217_v43 = vld [vmem:[#allocation2 + $0x28] sm:$0xff] }
0x12f0   :  { %v1658_v49 = vmul.f32 -1.442695, %v1156_v44  ;;  %v1659_v13 = vmul.f32 -1.442695, %v1176_v12 }
0x12f2   :  { %1772 = vpow2.f32 %v1658_v49 }
0x12f8   :  { %v1773_v50 = vpop.eup %1772 }
0x12f9   :  { %v1160_v51 = vadd.f32 1.0, %v1773_v50 }
0x12fb   :  { %1774 = vrcp.f32 %v1160_v51  ;;  %v1172_v56 = vand.u32 2147483648, %v1160_v51  ;;  %v1170_v63 = vand.u32 2147483647, %v1160_v51  ;;  %vm1166_vm5 = vweird.f32 %v1160_v51 }
0x12fd   :  { %v1173_v55 = vor.u32 1.1754944e-38, %v1172_v56  ;;  %vm1171_vm9 = vcmp.eq.f32.partialorder %v1170_v63, 8.507059e+37 }
0x1301   :  { %v1775_v52 = vpop.eup %1774 }
0x1302   :  { %v1162_v53 = vmul.f32 %v1775_v52, %v1160_v51  ;;  %vm1167_vm4 = vweird.f32 %v1775_v52 }
0x1303   :  { %vm1168_vm7 = vmor %vm1166_vm5, %vm1167_vm4 }
0x1304   :  { %v1163_v54 = vsub.f32 1.0, %v1162_v53 }
0x1305   :  { %v1197_v5 = vpop.permute.xlu0 %1196 }
0x1306   :  { %v1164_v62 = vmul.f32 %v1775_v52, %v1163_v54 }
0x1308   :  { %v1165_v1 = vadd.f32 %v1775_v52, %v1164_v62 }
0x130a   :  { %v1169_v4 = vsel %vm1168_vm7, %v1775_v52, %v1165_v1 }
0x130b   :  { %v1174_v3 = vsel %vm1171_vm9, %v1173_v55, %v1169_v4 }
0x130c   :  { %v1199_v6 = vmul.f32 %v1197_v5, %v1174_v3 }
0x130e   :  { %1201 = vrot.lane.b32.xlu1 %v1199_v6, %s1848_s14 }
0x1380   :  { %v1202_v39 = vpop.permute.xlu1 %1201 }
0x1381   :  { %v1204_v9 = vadd.f32 %v1202_v39, %v1128_v8 }
0x1383   :  { %1776 = vtanh.f32 %v1204_v9 }
0x1384   :  { %1778 = vpow2.f32 %v1659_v13 }
0x1389   :  { %v1777_v10 = vpop.eup %1776 }
0x138a   :  { %1208 = vrot.lane.b32.xlu2 %v1777_v10, %s1850_s6  ;;  %v1779_v14 = vpop.eup %1778 }
0x138b   :  { %v1180_v15 = vadd.f32 1.0, %v1779_v14 }
0x138d   :  { %1780 = vrcp.f32 %v1180_v15  ;;  %v1192_v22 = vand.u32 2147483648, %v1180_v15  ;;  %vm1186_vm11 = vweird.f32 %v1180_v15  ;;  %v1190_v7 = vand.u32 2147483647, %v1180_v15 }
0x138f   :  { %v1193_v59 = vor.u32 1.1754944e-38, %v1192_v22  ;;  %vm1191_vm13 = vcmp.eq.f32.partialorder %v1190_v7, 8.507059e+37 }
0x1393   :  { %v1781_v16 = vpop.eup %1780 }
0x1394   :  { %v1182_v18 = vmul.f32 %v1781_v16, %v1180_v15  ;;  %vm1187_vm10 = vweird.f32 %v1781_v16 }
0x1395   :  { %vm1188_vm12 = vmor %vm1186_vm11, %vm1187_vm10 }
0x1396   :  { %v1183_v20 = vsub.f32 1.0, %v1182_v18 }
0x1398   :  { %v1184_v57 = vmul.f32 %v1781_v16, %v1183_v20 }
0x139a   :  { %v1185_v21 = vadd.f32 %v1781_v16, %v1184_v57 }
0x139c   :  { %v1189_v58 = vsel %vm1188_vm12, %v1781_v16, %v1185_v21  ;;  %v1305_v16 = vld [vmem:[#allocation2 + $0x10] sm:$0xff] }
0x139d   :  { %v1194_v60 = vsel %vm1191_vm13, %v1193_v59, %v1189_v58 }
0x139e   :  { %v1206_v17 = vsub.f32 1.0, %v1194_v60  ;;  %v1212_v23 = vmul.f32 %v1194_v60, %v1124_v37 }
0x13e4   :  { %v1209_v61 = vpop.permute.xlu2 %1208 }
0x13e5   :  { %v1211_v42 = vmul.f32 %v1209_v61, %v1206_v17 }
0x13e7   :  { %v1213_v45 = vadd.f32 %v1212_v23, %v1211_v42 }
0x13e9   :  { %1215 = vst.msk [vmem:[#allocation4 + $0x18] sm:$0xff] %vm74_vm6, %v1213_v45  ;;  %1660 = vmatmul.msk.f32.vlgmr.msrb.gmra.mxu1 %vm74_vm6, %v1213_v45 }
0x1466   :  { %v1238_v46 = vpop.f32.mrf.mxu1 }
0x1467   :  { %v1239_v41 = vadd.f32 %v2220_v2, %v1238_v46 }
0x1469   :  { %1285 = vrot.lane.b32.xlu1 %v1239_v41, %s1849_s16  ;;  %1242 = vrot.lane.b32.xlu0 %v1239_v41, %s1850_s6 }
0x14db   :  { %v1243_v24 = vpop.permute.xlu0 %1242  ;;  %v1286_v38 = vpop.permute.xlu1 %1285 }
0x14dc   :  { %v1245_v25 = vadd.f32 %v1243_v24, %v2106_v0  ;;  %v1265_v51 = vadd.f32 %v1243_v24, %v1217_v43 }
0x14de   :  { %v1661_v27 = vmul.f32 -1.442695, %v1245_v25  ;;  %v1662_v52 = vmul.f32 -1.442695, %v1265_v51  ;;  %v1818_v25 = vld [vmem:[%s2352_s8] ss:$0 sm:$0xff] }
0x14e0   :  { %1782 = vpow2.f32 %v1661_v27  ;;  %v813_v27 = vadd.f32 %v1818_v25, %v2250_v30 }
0x14e6   :  { %v1783_v28 = vpop.eup %1782 }
0x14e7   :  { %v1249_v11 = vadd.f32 1.0, %v1783_v28  ;;  %v1306_v28 = vld [vmem:[#allocation2 + $0x18] sm:$0xff] }
0x14e9   :  { %1784 = vrcp.f32 %v1249_v11  ;;  %v1261_v48 = vand.u32 2147483648, %v1249_v11  ;;  %v1259_v34 = vand.u32 2147483647, %v1249_v11  ;;  %vm1255_vm15 = vweird.f32 %v1249_v11 }
0x14eb   :  { %v1262_v36 = vor.u32 1.1754944e-38, %v1261_v48  ;;  %vm1260_vm1 = vcmp.eq.f32.partialorder %v1259_v34, 8.507059e+37 }
0x14ef   :  { %v1785_v29 = vpop.eup %1784 }
0x14f0   :  { %v1251_v47 = vmul.f32 %v1785_v29, %v1249_v11  ;;  %vm1256_vm14 = vweird.f32 %v1785_v29 }
0x14f1   :  { %vm1257_vm0 = vmor %vm1255_vm15, %vm1256_vm14 }
0x14f2   :  { %v1252_v31 = vsub.f32 1.0, %v1251_v47 }
0x14f4   :  { %v1253_v32 = vmul.f32 %v1785_v29, %v1252_v31 }
0x14f6   :  { %v1254_v35 = vadd.f32 %v1785_v29, %v1253_v32 }
0x14f8   :  { %v1258_v37 = vsel %vm1257_vm0, %v1785_v29, %v1254_v35 }
0x14f9   :  { %v1263_v0 = vsel %vm1260_vm1, %v1262_v36, %v1258_v37 }
0x14fa   :  { %v1288_v40 = vmul.f32 %v1286_v38, %v1263_v0 }
0x14fc   :  { %1290 = vrot.lane.b32.xlu2 %v1288_v40, %s1848_s14 }
0x1556   :  { %v1291_v44 = vpop.permute.xlu2 %1290 }
0x1557   :  { %v1293_v49 = vadd.f32 %v1291_v44, %v1217_v43 }
0x1559   :  { %1786 = vtanh.f32 %v1293_v49 }
0x155a   :  { %1788 = vpow2.f32 %v1662_v52 }
0x155f   :  { %v1787_v50 = vpop.eup %1786 }
0x1560   :  { %1297 = vrot.lane.b32.xlu0 %v1787_v50, %s1850_s6  ;;  %v1789_v53 = vpop.eup %1788 }
0x1561   :  { %v1269_v54 = vadd.f32 1.0, %v1789_v53 }
0x1563   :  { %1790 = vrcp.f32 %v1269_v54  ;;  %v1281_v4 = vand.u32 2147483648, %v1269_v54  ;;  %vm1275_vm3 = vweird.f32 %v1269_v54  ;;  %v1279_v5 = vand.u32 2147483647, %v1269_v54 }
0x1565   :  { %v1282_v6 = vor.u32 1.1754944e-38, %v1281_v4  ;;  %vm1280_vm5 = vcmp.eq.f32.partialorder %v1279_v5, 8.507059e+37 }
0x1569   :  { %v1791_v56 = vpop.eup %1790 }
0x156a   :  { %v1271_v62 = vmul.f32 %v1791_v56, %v1269_v54  ;;  %vm1276_vm2 = vweird.f32 %v1791_v56 }
0x156b   :  { %vm1277_vm4 = vmor %vm1275_vm3, %vm1276_vm2 }
0x156c   :  { %v1272_v63 = vsub.f32 1.0, %v1271_v62 }
0x156e   :  { %v1273_v1 = vmul.f32 %v1791_v56, %v1272_v63 }
0x1570   :  { %v1274_v55 = vadd.f32 %v1791_v56, %v1273_v1 }
0x1572   :  { %v1278_v3 = vsel %vm1277_vm4, %v1791_v56, %v1274_v55  ;;  %v1819_v56 = vld [vmem:[#allocation2 + $0x60] sm:$0xff] }
0x1573   :  { %v1283_v8 = vsel %vm1280_vm5, %v1282_v6, %v1278_v3  ;;  %v815_v62 = vadd.f32 %v1819_v56, %v813_v27 }
0x1574   :  { %v1295_v39 = vsub.f32 1.0, %v1283_v8  ;;  %v1301_v10 = vmul.f32 %v1283_v8, %v1213_v45 }
0x1575   :  { %v1647_v63 = vmul.f32 -1.442695, %v815_v62 }
0x15d2   :  { %v1298_v9 = vpop.permute.xlu0 %1297 }
0x15d3   :  { %v1300_v12 = vmul.f32 %v1298_v9, %v1295_v39 }
0x15d5   :  { %v2283_v13 = vadd.f32 %v1301_v10, %v1300_v12 }
0x15d7   :  { %1304 = vst.msk [vmem:[#allocation4 + $0x10] sm:$0xff] %vm74_vm6, %v2283_v13  ;;  %1663 = vmatmul.msk.f32.vlgmr.msra.gmra.mxu2 %vm74_vm6, %v2283_v13 }
0x165a   :  { %v1327_v14 = vpop.f32.mrf.mxu2 }
0x165b   :  { %v1328_v15 = vadd.f32 %v2220_v2, %v1327_v14 }
0x165d   :  { %1374 = vrot.lane.b32.xlu2 %v1328_v15, %s1849_s16  ;;  %1331 = vrot.lane.b32.xlu1 %v1328_v15, %s1850_s6 }
0x16b7   :  { %v1375_v46 = vpop.permute.xlu2 %1374 }
0x16cf   :  { %v1332_v18 = vpop.permute.xlu1 %1331 }
0x16d0   :  { %v1334_v20 = vadd.f32 %v1332_v18, %v1305_v16  ;;  %v1354_v31 = vadd.f32 %v1332_v18, %v1306_v28 }
0x16d2   :  { %v1664_v57 = vmul.f32 -1.442695, %v1334_v20  ;;  %v1665_v48 = vmul.f32 -1.442695, %v1354_v31  ;;  %v1394_v20 = vld [vmem:[#allocation2] sm:$0xff] }
0x16d4   :  { %1792 = vpow2.f32 %v1664_v57 }
0x16da   :  { %v1793_v21 = vpop.eup %1792 }
0x16db   :  { %v1338_v22 = vadd.f32 1.0, %v1793_v21 }
0x16dd   :  { %1794 = vrcp.f32 %v1338_v22  ;;  %v1350_v60 = vand.u32 2147483648, %v1338_v22  ;;  %v1348_v61 = vand.u32 2147483647, %v1338_v22  ;;  %vm1344_vm9 = vweird.f32 %v1338_v22 }
0x16df   :  { %v1351_v42 = vor.u32 1.1754944e-38, %v1350_v60  ;;  %vm1349_vm11 = vcmp.eq.f32.partialorder %v1348_v61, 8.507059e+37 }
0x16e3   :  { %v1795_v7 = vpop.eup %1794 }
0x16e4   :  { %v1340_v58 = vmul.f32 %v1795_v7, %v1338_v22  ;;  %vm1345_vm7 = vweird.f32 %v1795_v7 }
0x16e5   :  { %vm1346_vm10 = vmor %vm1344_vm9, %vm1345_vm7 }
0x16e6   :  { %v1341_v59 = vsub.f32 1.0, %v1340_v58 }
0x16e8   :  { %v1342_v17 = vmul.f32 %v1795_v7, %v1341_v59 }
0x16ea   :  { %v1343_v23 = vadd.f32 %v1795_v7, %v1342_v17 }
0x16ec   :  { %v1347_v45 = vsel %vm1346_vm10, %v1795_v7, %v1343_v23  ;;  %v1508_v23 = vld [vmem:[#allocation4 + $0x28] sm:$0xff] }
0x16ed   :  { %v1352_v41 = vsel %vm1349_vm11, %v1351_v42, %v1347_v45  ;;  %v1509_v45 = vld [vmem:[#allocation4 + $0x30] sm:$0xff] }
0x16ee   :  { %v1377_v24 = vmul.f32 %v1375_v46, %v1352_v41  ;;  %v1688_v41 = vpack.i.bf16 %v1508_v23, %v1509_v45  ;;  %v1500_v23 = vld [vmem:[#allocation3 + $0x20] sm:$0xff] }
0x16f0   :  { %1379 = vrot.lane.b32.xlu0 %v1377_v24, %s1848_s14 }
0x16f8   :  { %836 = vrot.lane.b32.xlu0 %v813_v27, %s1848_s14 }
0x1762   :  { %v1380_v11 = vpop.permute.xlu0 %1379 }
0x1763   :  { %v1382_v29 = vadd.f32 %v1380_v11, %v1306_v28 }
0x1765   :  { %1796 = vtanh.f32 %v1382_v29 }
0x1766   :  { %1798 = vpow2.f32 %v1665_v48  ;;  %v1482_v48 = vld [vmem:[%s2346_s2] sm:$0xff] }
0x176a   :  { %v837_v14 = vpop.permute.xlu0 %836 }
0x176b   :  { %v1797_v47 = vpop.eup %1796 }
0x176c   :  { %1386 = vrot.lane.b32.xlu1 %v1797_v47, %s1850_s6  ;;  %v1799_v32 = vpop.eup %1798 }
0x176d   :  { %v1358_v34 = vadd.f32 1.0, %v1799_v32 }
0x176f   :  { %1800 = vrcp.f32 %v1358_v34  ;;  %v1370_v0 = vand.u32 2147483648, %v1358_v34  ;;  %vm1364_vm13 = vweird.f32 %v1358_v34  ;;  %v1368_v40 = vand.u32 2147483647, %v1358_v34 }
0x1770   :  { %1802 = vpow2.f32 %v1647_v63 }
0x1771   :  { %v1371_v44 = vor.u32 1.1754944e-38, %v1370_v0  ;;  %vm1369_vm15 = vcmp.eq.f32.partialorder %v1368_v40, 8.507059e+37  ;;  %v1395_v40 = vld [vmem:[#allocation2 + $0x8] sm:$0xff] }
0x1775   :  { %v1801_v35 = vpop.eup %1800 }
0x1776   :  { %v1360_v36 = vmul.f32 %v1801_v35, %v1358_v34  ;;  %vm1365_vm12 = vweird.f32 %v1801_v35  ;;  %v1803_v1 = vpop.eup %1802 }
0x1777   :  { %vm1366_vm14 = vmor %vm1364_vm13, %vm1365_vm12  ;;  %v819_v55 = vadd.f32 1.0, %v1803_v1 }
0x1778   :  { %v1361_v37 = vsub.f32 1.0, %v1360_v36 }
0x1779   :  { %1804 = vrcp.f32 %v819_v55  ;;  %v831_v10 = vand.u32 2147483648, %v819_v55  ;;  %vm825_vm1 = vweird.f32 %v819_v55  ;;  %v829_v12 = vand.u32 2147483647, %v819_v55 }
0x177a   :  { %v1362_v38 = vmul.f32 %v1801_v35, %v1361_v37 }
0x177b   :  { %v832_v15 = vor.u32 1.1754944e-38, %v831_v10  ;;  %vm830_vm3 = vcmp.eq.f32.partialorder %v829_v12, 8.507059e+37 }
0x177c   :  { %v1363_v30 = vadd.f32 %v1801_v35, %v1362_v38 }
0x177e   :  { %v1367_v43 = vsel %vm1366_vm14, %v1801_v35, %v1363_v30  ;;  %v1505_v30 = vld [vmem:[#allocation4 + $0x10] sm:$0xff] }
0x177f   :  { %v1372_v49 = vsel %vm1369_vm15, %v1371_v44, %v1367_v43  ;;  %v1805_v4 = vpop.eup %1804  ;;  %vm1545_vm15 = vcmask 457728  }
0x1780   :  { %v1384_v50 = vsub.f32 1.0, %v1372_v49  ;;  %v1390_v52 = vmul.f32 %v1372_v49, %v2283_v13  ;;  %v821_v5 = vmul.f32 %v1805_v4, %v819_v55  ;;  %vm826_vm0 = vweird.f32 %v1805_v4  ;;  %v1483_v49 = vld [vmem:[%s2346_s2 + $0x8] sm:$0xff]  ;;  %s1851_s2 = smov [#allocation5]  }
0x1781   :  { %vm827_vm2 = vmor %vm825_vm1, %vm826_vm0  ;;  %s1581_s3 = sshll.u32 %s1851_s2, 4  ;;  %s1582_s3 = int_to_ptr.vmem [resolvable:$true] %s1581_s3 }
0x1782   :  { %v822_v3 = vsub.f32 1.0, %v821_v5 }
0x1784   :  { %v823_v6 = vmul.f32 %v1805_v4, %v822_v3 }
0x1786   :  { %v824_v39 = vadd.f32 %v1805_v4, %v823_v6 }
0x1788   :  { %v828_v13 = vsel %vm827_vm2, %v1805_v4, %v824_v39 }
0x1789   :  { %v833_v16 = vsel %vm830_vm3, %v832_v15, %v828_v13 }
0x178a   :  { %v839_v18 = vmul.f32 %v837_v14, %v833_v16  ;;  %v846_v32 = vsub.f32 1.0, %v833_v16  ;;  %v852_v35 = vmul.f32 %v833_v16, %v2238_v19  ;;  %v1506_v19 = vld [vmem:[#allocation4 + $0x18] sm:$0xff] }
0x17de   :  { %v1387_v51 = vpop.permute.xlu1 %1386 }
0x17df   :  { %v1389_v53 = vmul.f32 %v1387_v51, %v1384_v50  ;;  %v1507_v51 = vld [vmem:[#allocation4 + $0x20] sm:$0xff] }
0x17e1   :  { %v2300_v54 = vadd.f32 %v1390_v52, %v1389_v53  ;;  %v1693_v52 = vpack.i.bf16 %v1506_v19, %v1507_v51 }
0x17e3   :  { %1393 = vst.msk [vmem:[#allocation4 + $0x8] sm:$0xff] %vm74_vm6, %v2300_v54  ;;  %1666 = vmatmul.msk.f32.vlgmr.msrb.gmra.mxu3 %vm74_vm6, %v2300_v54 }
0x17ea   :  { %v1504_v38 = vld [vmem:[#allocation4 + $0x8] sm:$0xff] }
0x17eb   :  { %v1698_v0 = vpack.i.bf16 %v1504_v38, %v1505_v30 }
0x1866   :  { %v1416_v8 = vpop.f32.mrf.mxu3 }
0x1867   :  { %v1417_v9 = vadd.f32 %v2220_v2, %v1416_v8 }
0x1869   :  { %1463 = vrot.lane.b32.xlu1 %v1417_v9, %s1849_s16  ;;  %1420 = vrot.lane.b32.xlu2 %v1417_v9, %s1850_s6 }
0x1871   :  { %841 = vrot.lane.b32.xlu2 %v839_v18, %s1848_s14 }
0x18c3   :  { %v1421_v57 = vpop.permute.xlu2 %1420 }
0x18c4   :  { %v1423_v21 = vadd.f32 %v1421_v57, %v1394_v20  ;;  %v1443_v53 = vadd.f32 %v1421_v57, %v1395_v40 }
0x18c6   :  { %v1667_v2 = vmul.f32 -1.442695, %v1423_v21 }
0x18c8   :  { %1806 = vpow2.f32 %v1667_v2 }
0x18cb   :  { %v842_v22 = vpop.permute.xlu2 %841 }
0x18cc   :  { %v844_v7 = vadd.f32 %v1819_v56, %v842_v22  ;;  %v1668_v56 = vmul.f32 -1.442695, %v1443_v53 }
0x18ce   :  { %v1807_v58 = vpop.eup %1806  ;;  %1808 = vtanh.f32 %v844_v7 }
0x18cf   :  { %v1427_v59 = vadd.f32 1.0, %v1807_v58 }
0x18d1   :  { %1810 = vrcp.f32 %v1427_v59  ;;  %v1439_v46 = vand.u32 2147483648, %v1427_v59  ;;  %v1437_v25 = vand.u32 2147483647, %v1427_v59  ;;  %vm1433_vm5 = vweird.f32 %v1427_v59 }
0x18d3   :  { %v1440_v28 = vor.u32 1.1754944e-38, %v1439_v46  ;;  %vm1438_vm9 = vcmp.eq.f32.partialorder %v1437_v25, 8.507059e+37  ;;  %v1499_v46 = vld [vmem:[#allocation3 + $0x18] sm:$0xff]  ;;  %v1498_v25 = vld [vmem:[#allocation3 + $0x10] sm:$0xff] }
0x18d4   :  { %v1809_v60 = vpop.eup %1808 }
0x18d5   :  { %848 = vrot.lane.b32.xlu1 %v1809_v60, %s1850_s6 }
0x18d7   :  { %v1811_v17 = vpop.eup %1810 }
0x18d8   :  { %v1429_v61 = vmul.f32 %v1811_v17, %v1427_v59  ;;  %vm1434_vm4 = vweird.f32 %v1811_v17 }
0x18d9   :  { %vm1435_vm7 = vmor %vm1433_vm5, %vm1434_vm4 }
0x18da   :  { %v1430_v42 = vsub.f32 1.0, %v1429_v61 }
0x18db   :  { %v1464_v29 = vpop.permute.xlu1 %1463 }
0x18dc   :  { %v1431_v24 = vmul.f32 %v1811_v17, %v1430_v42 }
0x18dd   :  { %1689 = vrot.lane.b32.xlu1 %v1688_v41, %s1849_s16 }
0x18de   :  { %v1432_v27 = vadd.f32 %v1811_v17, %v1431_v24 }
0x18e0   :  { %v1436_v11 = vsel %vm1435_vm7, %v1811_v17, %v1432_v27 }
0x18e1   :  { %v1441_v47 = vsel %vm1438_vm9, %v1440_v28, %v1436_v11  ;;  %v1497_v28 = vld [vmem:[#allocation3 + $0x8] sm:$0xff] }
0x18e2   :  { %v1466_v31 = vmul.f32 %v1464_v29, %v1441_v47 }
0x18e4   :  { %1468 = vrot.lane.b32.xlu0 %v1466_v31, %s1848_s14  ;;  %v1496_v31 = vld [vmem:[#allocation3] sm:$0xff] }
0x18e5   :  { %1485 = vperm.xlu1 %1686, %v1482_v48  }
0x1947   :  { %v849_v34 = vpop.permute.xlu1 %848 }
0x1948   :  { %v851_v36 = vmul.f32 %v849_v34, %v846_v32 }
0x194a   :  { %v853_v37 = vadd.f32 %v852_v35, %v851_v36 }
0x194c   :  { %855 = vrot.lane.b32.xlu0 %v853_v37, %s1850_s6 }
0x194f   :  { %v1690_v20 = vpop.permute.xlu1 %1689 }
0x1950   :  { %v1692_v21 = vunpack.i.h.bf16 %v1690_v20  ;;  %v1691_v2 = vunpack.i.l.bf16 %v1690_v20 }
0x1954   :  { %1699 = vrot.lane.b32.xlu0 %v1698_v0, %s1849_s16 }
0x1956   :  { %v1469_v43 = vpop.permute.xlu0 %1468 }
0x1957   :  { %v1471_v44 = vadd.f32 %v1469_v43, %v1395_v40  ;;  %v1486_v29 = vpop.permute.xlu1 %1485 }
0x1958   :  { %vm1490_vm14 = vcmp.eq.s32.totalorder %v1486_v29, %v2015_v26 }
0x1959   :  { %1812 = vtanh.f32 %v1471_v44  ;;  %v1669_v32 = vsel %vm1490_vm14, 1.0, %v1847_v33 }
0x195a   :  { %1814 = vpow2.f32 %v1668_v56 }
0x195c   :  { %1488 = vperm.xlu0 %1685, %v1483_v49  }
0x195f   :  { %v1813_v50 = vpop.eup %1812 }
0x1960   :  { %1475 = vrot.lane.b32.xlu2 %v1813_v50, %s1850_s6  ;;  %v1815_v62 = vpop.eup %1814 }
0x1961   :  { %v1447_v63 = vadd.f32 1.0, %v1815_v62 }
0x1963   :  { %1816 = vrcp.f32 %v1447_v63  ;;  %v1459_v6 = vand.u32 2147483648, %v1447_v63  ;;  %vm1453_vm11 = vweird.f32 %v1447_v63  ;;  %v1457_v8 = vand.u32 2147483647, %v1447_v63 }
0x1965   :  { %v1460_v9 = vor.u32 1.1754944e-38, %v1459_v6  ;;  %vm1458_vm13 = vcmp.eq.f32.partialorder %v1457_v8, 8.507059e+37 }
0x1968   :  { %1694 = vrot.lane.b32.xlu2 %v1693_v52, %s1849_s16 }
0x1969   :  { %v1817_v1 = vpop.eup %1816 }
0x196a   :  { %v1449_v55 = vmul.f32 %v1817_v1, %v1447_v63  ;;  %vm1454_vm10 = vweird.f32 %v1817_v1 }
0x196b   :  { %vm1455_vm12 = vmor %vm1453_vm11, %vm1454_vm10 }
0x196c   :  { %v1450_v4 = vsub.f32 1.0, %v1449_v55 }
0x196e   :  { %v1451_v5 = vmul.f32 %v1817_v1, %v1450_v4 }
0x1970   :  { %v1452_v3 = vadd.f32 %v1817_v1, %v1451_v5 }
0x1972   :  { %v1456_v39 = vsel %vm1455_vm12, %v1817_v1, %v1452_v3 }
0x1973   :  { %v1461_v10 = vsel %vm1458_vm13, %v1460_v9, %v1456_v39 }
0x1974   :  { %v1473_v12 = vsub.f32 1.0, %v1461_v10  ;;  %v1479_v14 = vmul.f32 %v1461_v10, %v2300_v54  ;;  %v1501_v54 = vld [vmem:[#allocation3 + $0x28] sm:$0xff] }
0x1975   :  { %v1543_v61 = vsel %vm74_vm6, %v1501_v54, %v1692_v21 }
0x19ba   :  { %v1476_v13 = vpop.permute.xlu2 %1475 }
0x19bb   :  { %v1478_v15 = vmul.f32 %v1476_v13, %v1473_v12 }
0x19bd   :  { %v1480_v16 = vadd.f32 %v1479_v14, %v1478_v15 }
0x19be   :  { %v856_v18 = vpop.permute.xlu0 %855 }
0x19bf   :  { %1481 = vst.msk [vmem:[#allocation4] sm:$0xff] %vm74_vm6, %v1480_v16 }
0x19c0   :  { %859 = vst.msk [vmem:[#allocation3 + $0x30] sm:$0xff] %vm74_vm6, %v856_v18 }
0x19c2   :  { %v1695_v57 = vpop.permute.xlu2 %1694 }
0x19c3   :  { %v1696_v58 = vunpack.i.l.bf16 %v1695_v57  ;;  %v1697_v17 = vunpack.i.h.bf16 %v1695_v57 }
0x19c5   :  { %v1542_v45 = vsel %vm74_vm6, %v1500_v23, %v1696_v58  ;;  %v1541_v24 = vsel %vm74_vm6, %v1499_v46, %v1697_v17 }
0x19c6   :  { %v1503_v22 = vld [vmem:[#allocation4] sm:$0xff]  ;;  %v1700_v60 = vpop.permute.xlu0 %1699 }
0x19c7   :  { %1517 = vrot.lane.b32.xlu2 %v1503_v22, %s1849_s16  ;;  %v1502_v7 = vld [vmem:[#allocation3 + $0x30] sm:$0xff]  ;;  %v1701_v42 = vunpack.i.l.bf16 %v1700_v60  ;;  %v1702_v41 = vunpack.i.h.bf16 %v1700_v60 }
0x19c8   :  { %v1544_v59 = vsel %vm74_vm6, %v1502_v7, %v1691_v2 }
0x19c9   :  { %1561 = vmatpush.msrb.mxu0 %v1544_v59  ;;  %v1540_v27 = vsel %vm74_vm6, %v1498_v25, %v1701_v42  ;;  %v1539_v11 = vsel %vm74_vm6, %v1497_v28, %v1702_v41 }
0x19cb   :  { %1562 = vmatpush.msrb.mxu0 %v1543_v61 }
0x19cd   :  { %1563 = vmatpush.msrb.mxu0 %v1542_v45 }
0x19ce   :  { %v1489_v34 = vpop.permute.xlu0 %1488 }
0x19cf   :  { %1564 = vmatpush.msrb.mxu0 %v1541_v24  ;;  %vm1491_vm0 = vcmp.eq.s32.totalorder %v1489_v34, %v2015_v26 }
0x19d0   :  { %v1670_v35 = vsel %vm1491_vm0, 1.0, %v1847_v33 }
0x19d1   :  { %1565 = vmatpush.msrb.mxu0 %v1540_v27 }
0x19d3   :  { %1566 = vmatpush.msrb.mxu0 %v1539_v11 }
0x1a21   :  { %v1518_v47 = vpop.permute.xlu2 %1517 }
0x1a22   :  { %v1538_v48 = vsel %vm74_vm6, %v1496_v31, %v1518_v47 }
0x1a23   :  { %1567 = vmatpush.msrb.mxu0 %v1538_v48 }
0x1a24   :  { %1671 = vmatmul.msk.f32.vlgmr.msrb.gmra.mxu0 %vm1545_vm15, %v1669_v32 }
0x1a2c   :  { %1672 = vmatmul.msk.f32.gmra.mxu0 %vm1545_vm15, %v1670_v35 }
0x1aa1   :  { %v1569_v36 = vpop.f32.mrf.mxu0 }
0x1aa2   :  { %1575 = vst.msk [vmem:[#allocation5] sm:$0xff] %vm333_vm8, %v1569_v36 }
0x1aa9   :  { %v1572_v37 = vpop.f32.mrf.mxu0 }
0x1aaa   :  { %1576 = vst.msk [vmem:[#allocation5 + $0x8] sm:$0xff] %vm333_vm8, %v1572_v37 }
0x1aab   :  { %1589 = dma.vmem_to_hbm [thread:$0]  %s1582_s3, 256, %s1584_s17, [#allocation6], %s1852_s18, %s1852_s18, %s1853_s19  }
0x1aac   :  { %1844 = dma.done.wait [#allocation6], 256  }
0x1aad   :  { %1845 = vsyncadd [#allocation6], 4294967040 }
0x1aae   :  { %1594 = vsyncpa [#allocation6], 1 }

</bundles_post_ra>
